<compile_context>
chip_gen: v6e
topology: v6e:2x2x1
jax: 0.10.0
libtpu: 0.0.40
codegen_flags: <defaults>
</compile_context>

<pallas_src>
import functools

import jax
import jax.numpy as jnp
from jax.experimental import pallas as pl
from jax.experimental.pallas import tpu as pltpu

BN_EPS = 1e-5


def _round_up(n, m):
    return ((n + m - 1) // m) * m


def _imgs_per_block(batch, rows_per_img, target_rows=1024):
    """Largest divisor d of batch with d*rows_per_img <= target_rows, keeping
    >= 2 grid steps when batch >= 2 (so both v7x TensorCores get work)."""
    best = 1
    for d in range(1, batch + 1):
        if batch % d != 0 or d * rows_per_img > target_rows:
            continue
        if batch >= 2 and batch // d < 2:
            continue
        best = d
    return best


# ---------------------------------------------------------------------------
# Pallas kernels
# ---------------------------------------------------------------------------
def _conv_bn_relu_pool_kernel(p_ref, w_ref, b_ref, o_ref, *, imgs, rows_pad):
    """Fused conv (im2col matmul) + BN (scale pre-folded) + ReLU + 2x2 maxpool.

    p_ref: (imgs*4*rows_pad, K)  corner-concatenated im2col patches; per image
           the 4 pool-corner blocks of rows_pad rows are stacked along M.
    w_ref: (K, Cout) conv weight with the BN scale folded in (bf16).
    b_ref: (1, Cout) folded BN/conv bias (f32).
    o_ref: (imgs*rows_pad, Cout) pooled activation.
    """
    w = w_ref[...]
    # ONE MXU dot per grid step; f32 accumulation.
    d = jnp.dot(p_ref[...].astype(w.dtype), w, preferred_element_type=jnp.float32)
    bias = b_ref[...]
    outs = []
    for img in range(imgs):
        base = img * 4 * rows_pad
        c0 = d[base + 0 * rows_pad:base + 1 * rows_pad]
        c1 = d[base + 1 * rows_pad:base + 2 * rows_pad]
        c2 = d[base + 2 * rows_pad:base + 3 * rows_pad]
        c3 = d[base + 3 * rows_pad:base + 4 * rows_pad]
        m = jnp.maximum(jnp.maximum(c0, c1), jnp.maximum(c2, c3))
        # +bias / ReLU commute with the corner max (monotone, per-channel).
        # TODO(synk): Dropout(0.2) after the ReLU is inference-mode identity.
        outs.append(jnp.maximum(m + bias, 0.0).astype(o_ref.dtype))
    o_ref[...] = outs[0] if imgs == 1 else jnp.concatenate(outs, axis=0)


def conv_bn_relu_pool(patches, w_mat, bias, batch, rows_pad, out_dtype, imgs_per_blk):
    """patches: (batch*4*rows_pad, K); returns (batch*rows_pad, Cout)."""
    _, K = patches.shape
    cout = w_mat.shape[1]
    n_blk = batch // imgs_per_blk
    blk_in = imgs_per_blk * 4 * rows_pad
    blk_out = imgs_per_blk * rows_pad
    kernel = functools.partial(_conv_bn_relu_pool_kernel,
                               imgs=imgs_per_blk, rows_pad=rows_pad)
    return pl.pallas_call(
        kernel,
        out_shape=jax.ShapeDtypeStruct((batch * rows_pad, cout), out_dtype),
        grid=(n_blk,),
        in_specs=[
            pl.BlockSpec((blk_in, K), lambda m: (m, 0)),     # patches, tiled over M
            pl.BlockSpec((K, cout), lambda m: (0, 0)),       # weight, resident
            pl.BlockSpec((1, cout), lambda m: (0, 0)),       # bias, resident
        ],
        out_specs=pl.BlockSpec((blk_out, cout), lambda m: (m, 0)),
        compiler_params=pltpu.CompilerParams(
            dimension_semantics=("parallel",)),
    )(patches, w_mat, bias)


def _mlp_kernel(x_ref, w1_ref, b1_ref, w2_ref, b2_ref, o_ref):
    w1 = w1_ref[...]
    h = jnp.dot(x_ref[...].astype(w1.dtype), w1,
                preferred_element_type=jnp.float32) + b1_ref[...]
    h = jnp.maximum(h, 0.0)
    # TODO(synk): Dropout(0.5) between the layers is inference-mode identity.
    o_ref[...] = (jnp.dot(h, w2_ref[...], preferred_element_type=jnp.float32)
                  + b2_ref[...]).astype(o_ref.dtype)


def mlp(x, w1, b1, w2, b2, tm=256):
    """x: (B, D). Weights resident, rows tiled; fc2 already lane-padded."""
    B, D = x.shape
    tm = min(tm, _round_up(B, 8))
    m_pad = _round_up(B, tm)
    if m_pad > B:
        x = jnp.pad(x, ((0, m_pad - B), (0, 0)))
    nout = w2.shape[1]
    out = pl.pallas_call(
        _mlp_kernel,
        out_shape=jax.ShapeDtypeStruct((m_pad, nout), jnp.float32),
        grid=(m_pad // tm,),
        in_specs=[
            pl.BlockSpec((tm, D), lambda m: (m, 0)),          # activations, tiled
            pl.BlockSpec(w1.shape, lambda m: (0, 0)),         # fc1 weight, resident
            pl.BlockSpec(b1.shape, lambda m: (0, 0)),
            pl.BlockSpec(w2.shape, lambda m: (0, 0)),         # fc2 (lane-padded), resident
            pl.BlockSpec(b2.shape, lambda m: (0, 0)),
        ],
        out_specs=pl.BlockSpec((tm, nout), lambda m: (m, 0)),
        compiler_params=pltpu.CompilerParams(
            dimension_semantics=("parallel",)),
    )(x, w1, b1, w2, b2)
    return out[:B]


# ---------------------------------------------------------------------------
# Glue: corner-concatenated, row-padded im2col patches (XLA side)
# ---------------------------------------------------------------------------
def pooled_corner_patches(x, k, rows_pad, dtype):
    """Patches for a valid k x k conv (stride 1) followed by 2x2/2 max-pool.

    x: (B, H, W, C) NHWC.  Returns ((B*4*rows_pad, k*k*C), (Hp, Wp)).
    Per image, the 4 pooling-corner patch blocks (rows ordered (hp, wp), padded
    with zeros to rows_pad rows, columns ordered (kh, kw, cin)) are stacked
    along the row axis -- so the conv kernel can do one tall dot per step and
    reduce the pool with 4 sublane-aligned row slices.
    """
    B, H, W, C = x.shape
    Ho, Wo = H - k + 1, W - k + 1
    Hp, Wp = Ho // 2, Wo // 2
    rows = Hp * Wp
    cols = [x[:, i:i + Ho, j:j + Wo, :] for i in range(k) for j in range(k)]
    p = jnp.concatenate(cols, axis=-1)                       # (B, Ho, Wo, k*k*C)
    K = k * k * C
    corners = []
    for ph in range(2):
        for pw in range(2):
            c = p[:, ph:ph + 2 * Hp:2, pw:pw + 2 * Wp:2, :]   # (B, Hp, Wp, K)
            c = c.reshape(B, rows, K)
            if rows_pad > rows:
                c = jnp.pad(c, ((0, 0), (0, rows_pad - rows), (0, 0)))
            corners.append(c)
    stacked = jnp.stack(corners, axis=1)                      # (B, 4, rows_pad, K)
    return stacked.reshape(B * 4 * rows_pad, K).astype(dtype), (Hp, Wp)


# ---------------------------------------------------------------------------
# Parameters (deterministic synthetic init) + one-time weight preparation
# ---------------------------------------------------------------------------
def init_params(key):
    ks = jax.random.split(key, 16)
    p = {}
    p["w_conv1"] = jax.random.normal(ks[0], (32, 1, 5, 5), jnp.float32) * 0.05
    p["b_conv1"] = jax.random.normal(ks[1], (32,), jnp.float32) * 0.05
    p["w_conv2"] = jax.random.normal(ks[2], (64, 32, 5, 5), jnp.float32) * 0.05
    p["b_conv2"] = jax.random.normal(ks[3], (64,), jnp.float32) * 0.05
    p["w_fc1"] = jax.random.normal(ks[4], (5 * 5 * 64, 256), jnp.float32) * 0.02
    p["b_fc1"] = jax.random.normal(ks[5], (256,), jnp.float32) * 0.02
    p["w_fc2"] = jax.random.normal(ks[6], (256, 2), jnp.float32) * 0.05
    p["b_fc2"] = jax.random.normal(ks[7], (2,), jnp.float32) * 0.05
    # BatchNorm params / running stats (eval mode), slightly non-trivial.
    p["bn1_gamma"] = 1.0 + 0.1 * jax.random.normal(ks[8], (32,), jnp.float32)
    p["bn1_beta"] = 0.1 * jax.random.normal(ks[9], (32,), jnp.float32)
    p["bn1_mean"] = 0.1 * jax.random.normal(ks[10], (32,), jnp.float32)
    p["bn1_var"] = 1.0 + 0.1 * jnp.abs(jax.random.normal(ks[11], (32,), jnp.float32))
    p["bn2_gamma"] = 1.0 + 0.1 * jax.random.normal(ks[12], (64,), jnp.float32)
    p["bn2_beta"] = 0.1 * jax.random.normal(ks[13], (64,), jnp.float32)
    p["bn2_mean"] = 0.1 * jax.random.normal(ks[14], (64,), jnp.float32)
    p["bn2_var"] = 1.0 + 0.1 * jnp.abs(jax.random.normal(ks[15], (64,), jnp.float32))
    return p


def prepare_params(p):
    """One-time weight prep (run OUTSIDE the per-call jit): BN folding, conv
    weight transpose/reshape, fc1 NCHW-flatten row permutation, fc2 lane
    padding, bf16 casts."""
    # layer 1: fold BN scale into conv weight columns, BN shift into bias.
    scale1 = p["bn1_gamma"] / jnp.sqrt(p["bn1_var"] + BN_EPS)
    w1 = jnp.transpose(p["w_conv1"], (2, 3, 1, 0)).reshape(25, 32) * scale1[None, :]
    b1 = ((p["b_conv1"] - p["bn1_mean"]) * scale1 + p["bn1_beta"]).reshape(1, 32)
    # layer 2
    scale2 = p["bn2_gamma"] / jnp.sqrt(p["bn2_var"] + BN_EPS)
    w2 = jnp.transpose(p["w_conv2"], (2, 3, 1, 0)).reshape(800, 64) * scale2[None, :]
    b2 = ((p["b_conv2"] - p["bn2_mean"]) * scale2 + p["bn2_beta"]).reshape(1, 64)
    # fc1: permute rows so a (h, w, c)-flattened NHWC activation matches
    # PyTorch's NCHW .view(-1, 5*5*64) @ w_fc1.
    h_idx = jnp.arange(5)[:, None, None]
    w_idx = jnp.arange(5)[None, :, None]
    c_idx = jnp.arange(64)[None, None, :]
    perm = (c_idx * 25 + h_idx * 5 + w_idx).reshape(-1)
    w_fc1 = p["w_fc1"][perm, :].astype(jnp.bfloat16)
    b_fc1 = p["b_fc1"].reshape(1, 256)
    # fc2: zero-pad to 128 output lanes so the Pallas store is lane-dense.
    w_fc2 = jnp.zeros((256, 128), jnp.float32).at[:, :2].set(p["w_fc2"])
    b_fc2 = jnp.zeros((1, 128), jnp.float32).at[:, :2].set(p["b_fc2"].reshape(1, 2))
    return {
        "w1": w1.astype(jnp.bfloat16), "b1": b1,
        "w2": w2.astype(jnp.bfloat16), "b2": b2,
        "w_fc1": w_fc1, "b_fc1": b_fc1,
        "w_fc2": w_fc2, "b_fc2": b_fc2,
    }


# ---------------------------------------------------------------------------
# Full forward pass (mirrors CNN.forward, inference mode)
# ---------------------------------------------------------------------------
def cnn_forward(prep, x_nchw):
    B = x_nchw.shape[0]
    x = jnp.transpose(x_nchw, (0, 2, 3, 1))                   # NCHW -> NHWC (B,32,32,1)

    # --- layer_1: Conv2d(1,32,5)+BN+ReLU+Dropout(0.2)+MaxPool(2), fused -----
    rows1, rows1_pad = 14 * 14, 200                            # 196 -> pad to 8-multiple
    p1, (hp1, wp1) = pooled_corner_patches(x, 5, rows1_pad, jnp.bfloat16)   # (B*800, 25)
    imgs1 = _imgs_per_block(B, 4 * rows1_pad)
    a1 = conv_bn_relu_pool(p1, prep["w1"], prep["b1"], B, rows1_pad,
                           jnp.bfloat16, imgs1)                # (B*200, 32) bf16
    a1_img = a1.reshape(B, rows1_pad, 32)[:, :rows1, :].reshape(B, hp1, wp1, 32)

    # --- layer_2: Conv2d(32,64,5)+BN+ReLU+Dropout(0.2)+MaxPool(2), fused ----
    rows2, rows2_pad = 5 * 5, 32
    p2, _ = pooled_corner_patches(a1_img, 5, rows2_pad, jnp.bfloat16)       # (B*128, 800)
    imgs2 = _imgs_per_block(B, 4 * rows2_pad)
    a2 = conv_bn_relu_pool(p2, prep["w2"], prep["b2"], B, rows2_pad,
                           jnp.float32, imgs2)                 # (B*32, 64) f32
    feat = a2.reshape(B, rows2_pad, 64)[:, :rows2, :].reshape(B, rows2 * 64)  # (B,1600)

    # --- MLP: Linear(1600,256)+ReLU+Dropout(0.5)+Linear(256,2) --------------
    logits = mlp(feat, prep["w_fc1"], prep["b_fc1"], prep["w_fc2"], prep["b_fc2"])
    return logits[:, :2]


if __name__ == "__main__":
    key = jax.random.PRNGKey(0)
    kp, kx = jax.random.split(key)
    params = init_params(kp)
    prep = prepare_params(params)          # one-time weight prep, outside the jit
    # The architecture implies 32x32 single-channel input (-> 5x5x64 features).
    x = jax.random.normal(kx, (2, 1, 32, 32), jnp.float32)

    fwd = jax.jit(cnn_forward)
    out = jax.block_until_ready(fwd(prep, x))
    assert out.shape == (2, 2), out.shape
    assert jnp.all(jnp.isfinite(out))
    print("KERNEL_OK")
</pallas_src>

<mosaic_0001>
module attributes {stable_mosaic.version = 11 : i64} {
  func.func @_conv_bn_relu_pool_kernel(%arg0: i32, %arg1: memref<800x25xbf16, #tpu.memory_space<vmem>>, %arg2: memref<25x32xbf16, #tpu.memory_space<vmem>>, %arg3: memref<1x32xf32, #tpu.memory_space<vmem>>, %arg4: memref<200x32xbf16, #tpu.memory_space<vmem>>) attributes {dimension_semantics = [#tpu.dimension_semantics<parallel>], iteration_bounds = array<i64: 2>, scalar_prefetch = 0 : i64, scratch_operands = 0 : i64, tpu.core_type = #tpu.core_type<tc>, window_params = [{transform_indices = @transform_0, window_bounds = array<i64: 800, 25>}, {pipeline_mode = #tpu.pipeline_mode<synchronous>, transform_indices = @transform_1, window_bounds = array<i64: 25, 32>}, {pipeline_mode = #tpu.pipeline_mode<synchronous>, transform_indices = @transform_2, window_bounds = array<i64: 1, 32>}, {transform_indices = @transform_3, window_bounds = array<i64: 200, 32>}]} {
    %c0 = arith.constant 0 : index
    %c0_0 = arith.constant 0 : index
    %0 = vector.load %arg2[%c0, %c0_0] : memref<25x32xbf16, #tpu.memory_space<vmem>>, vector<25x32xbf16>
    %c0_1 = arith.constant 0 : index
    %c0_2 = arith.constant 0 : index
    %1 = vector.load %arg1[%c0_1, %c0_2] : memref<800x25xbf16, #tpu.memory_space<vmem>>, vector<800x25xbf16>
    %cst = arith.constant dense<0.000000e+00> : vector<800x32xf32>
    %2 = tpu.matmul %1, %0, %cst {dimension_numbers = #tpu.dot_dimension_numbers<[1], [0], [0], [1], [0, 0, 1, 1], [], []>} : vector<800x25xbf16>, vector<25x32xbf16>, vector<800x32xf32> -> vector<800x32xf32>
    %c0_3 = arith.constant 0 : index
    %c0_4 = arith.constant 0 : index
    %3 = vector.load %arg3[%c0_3, %c0_4] : memref<1x32xf32, #tpu.memory_space<vmem>>, vector<1x32xf32>
    %4 = vector.extract_strided_slice %2 {offsets = [0, 0], sizes = [200, 32], strides = [1, 1]} : vector<800x32xf32> to vector<200x32xf32>
    %5 = vector.extract_strided_slice %2 {offsets = [200, 0], sizes = [200, 32], strides = [1, 1]} : vector<800x32xf32> to vector<200x32xf32>
    %6 = vector.extract_strided_slice %2 {offsets = [400, 0], sizes = [200, 32], strides = [1, 1]} : vector<800x32xf32> to vector<200x32xf32>
    %7 = vector.extract_strided_slice %2 {offsets = [600, 0], sizes = [200, 32], strides = [1, 1]} : vector<800x32xf32> to vector<200x32xf32>
    %8 = arith.maximumf %4, %5 : vector<200x32xf32>
    %9 = arith.maximumf %6, %7 : vector<200x32xf32>
    %10 = arith.maximumf %8, %9 : vector<200x32xf32>
    %11 = vector.broadcast %3 : vector<1x32xf32> to vector<200x32xf32>
    %12 = arith.addf %10, %11 : vector<200x32xf32>
    %cst_5 = arith.constant 0.000000e+00 : f32
    %13 = vector.broadcast %cst_5 : f32 to vector<200x32xf32>
    %14 = arith.maximumf %12, %13 : vector<200x32xf32>
    %15 = arith.truncf %14 : vector<200x32xf32> to vector<200x32xbf16>
    %c0_6 = arith.constant 0 : index
    %c0_7 = arith.constant 0 : index
    %16 = vector.load %arg4[%c0_6, %c0_7] : memref<200x32xbf16, #tpu.memory_space<vmem>>, vector<200x32xbf16>
    tpu.vector_store %arg4[%c0_6, %c0_7], %15 {strides = array<i32>} : memref<200x32xbf16, #tpu.memory_space<vmem>>, vector<200x32xbf16>,
    return
  }
  func.func @transform_0(%arg0: i32) -> (i32, i32) {
    %c0_i32 = arith.constant 0 : i32
    %c0_i32_0 = arith.constant 0 : i32
    return %arg0, %c0_i32 : i32, i32
  }
  func.func @transform_1(%arg0: i32) -> (i32, i32) {
    %c0_i32 = arith.constant 0 : i32
    %c0_i32_0 = arith.constant 0 : i32
    %c0_i32_1 = arith.constant 0 : i32
    return %c0_i32, %c0_i32_0 : i32, i32
  }
  func.func @transform_2(%arg0: i32) -> (i32, i32) {
    %c0_i32 = arith.constant 0 : i32
    %c0_i32_0 = arith.constant 0 : i32
    %c0_i32_1 = arith.constant 0 : i32
    return %c0_i32, %c0_i32_0 : i32, i32
  }
  func.func @transform_3(%arg0: i32) -> (i32, i32) {
    %c0_i32 = arith.constant 0 : i32
    %c0_i32_0 = arith.constant 0 : i32
    return %arg0, %c0_i32 : i32, i32
  }
}

module attributes {stable_mosaic.version = 11 : i64} {
  func.func @_conv_bn_relu_pool_kernel(%arg0: i32, %arg1: memref<128x800xbf16, #tpu.memory_space<vmem>>, %arg2: memref<800x64xbf16, #tpu.memory_space<vmem>>, %arg3: memref<1x64xf32, #tpu.memory_space<vmem>>, %arg4: memref<32x64xf32, #tpu.memory_space<vmem>>) attributes {dimension_semantics = [#tpu.dimension_semantics<parallel>], iteration_bounds = array<i64: 2>, scalar_prefetch = 0 : i64, scratch_operands = 0 : i64, tpu.core_type = #tpu.core_type<tc>, window_params = [{transform_indices = @transform_0, window_bounds = array<i64: 128, 800>}, {pipeline_mode = #tpu.pipeline_mode<synchronous>, transform_indices = @transform_1, window_bounds = array<i64: 800, 64>}, {pipeline_mode = #tpu.pipeline_mode<synchronous>, transform_indices = @transform_2, window_bounds = array<i64: 1, 64>}, {transform_indices = @transform_3, window_bounds = array<i64: 32, 64>}]} {
    %c0 = arith.constant 0 : index
    %c0_0 = arith.constant 0 : index
    %0 = vector.load %arg2[%c0, %c0_0] : memref<800x64xbf16, #tpu.memory_space<vmem>>, vector<800x64xbf16>
    %c0_1 = arith.constant 0 : index
    %c0_2 = arith.constant 0 : index
    %1 = vector.load %arg1[%c0_1, %c0_2] : memref<128x800xbf16, #tpu.memory_space<vmem>>, vector<128x800xbf16>
    %cst = arith.constant dense<0.000000e+00> : vector<128x64xf32>
    %2 = tpu.matmul %1, %0, %cst {dimension_numbers = #tpu.dot_dimension_numbers<[1], [0], [0], [1], [0, 0, 1, 1], [], []>} : vector<128x800xbf16>, vector<800x64xbf16>, vector<128x64xf32> -> vector<128x64xf32>
    %c0_3 = arith.constant 0 : index
    %c0_4 = arith.constant 0 : index
    %3 = vector.load %arg3[%c0_3, %c0_4] : memref<1x64xf32, #tpu.memory_space<vmem>>, vector<1x64xf32>
    %4 = vector.extract_strided_slice %2 {offsets = [0, 0], sizes = [32, 64], strides = [1, 1]} : vector<128x64xf32> to vector<32x64xf32>
    %5 = vector.extract_strided_slice %2 {offsets = [32, 0], sizes = [32, 64], strides = [1, 1]} : vector<128x64xf32> to vector<32x64xf32>
    %6 = vector.extract_strided_slice %2 {offsets = [64, 0], sizes = [32, 64], strides = [1, 1]} : vector<128x64xf32> to vector<32x64xf32>
    %7 = vector.extract_strided_slice %2 {offsets = [96, 0], sizes = [32, 64], strides = [1, 1]} : vector<128x64xf32> to vector<32x64xf32>
    %8 = arith.maximumf %4, %5 : vector<32x64xf32>
    %9 = arith.maximumf %6, %7 : vector<32x64xf32>
    %10 = arith.maximumf %8, %9 : vector<32x64xf32>
    %11 = vector.broadcast %3 : vector<1x64xf32> to vector<32x64xf32>
    %12 = arith.addf %10, %11 : vector<32x64xf32>
    %cst_5 = arith.constant 0.000000e+00 : f32
    %13 = vector.broadcast %cst_5 : f32 to vector<32x64xf32>
    %14 = arith.maximumf %12, %13 : vector<32x64xf32>
    %c0_6 = arith.constant 0 : index
    %c0_7 = arith.constant 0 : index
    %15 = vector.load %arg4[%c0_6, %c0_7] : memref<32x64xf32, #tpu.memory_space<vmem>>, vector<32x64xf32>
    tpu.vector_store %arg4[%c0_6, %c0_7], %14 {strides = array<i32>} : memref<32x64xf32, #tpu.memory_space<vmem>>, vector<32x64xf32>,
    return
  }
  func.func @transform_0(%arg0: i32) -> (i32, i32) {
    %c0_i32 = arith.constant 0 : i32
    %c0_i32_0 = arith.constant 0 : i32
    return %arg0, %c0_i32 : i32, i32
  }
  func.func @transform_1(%arg0: i32) -> (i32, i32) {
    %c0_i32 = arith.constant 0 : i32
    %c0_i32_0 = arith.constant 0 : i32
    %c0_i32_1 = arith.constant 0 : i32
    return %c0_i32, %c0_i32_0 : i32, i32
  }
  func.func @transform_2(%arg0: i32) -> (i32, i32) {
    %c0_i32 = arith.constant 0 : i32
    %c0_i32_0 = arith.constant 0 : i32
    %c0_i32_1 = arith.constant 0 : i32
    return %c0_i32, %c0_i32_0 : i32, i32
  }
  func.func @transform_3(%arg0: i32) -> (i32, i32) {
    %c0_i32 = arith.constant 0 : i32
    %c0_i32_0 = arith.constant 0 : i32
    return %arg0, %c0_i32 : i32, i32
  }
}

module attributes {stable_mosaic.version = 11 : i64} {
  func.func @_mlp_kernel(%arg0: i32, %arg1: memref<8x1600xf32, #tpu.memory_space<vmem>>, %arg2: memref<1600x256xbf16, #tpu.memory_space<vmem>>, %arg3: memref<1x256xf32, #tpu.memory_space<vmem>>, %arg4: memref<256x128xf32, #tpu.memory_space<vmem>>, %arg5: memref<1x128xf32, #tpu.memory_space<vmem>>, %arg6: memref<8x128xf32, #tpu.memory_space<vmem>>) attributes {dimension_semantics = [#tpu.dimension_semantics<parallel>], iteration_bounds = array<i64: 1>, scalar_prefetch = 0 : i64, scratch_operands = 0 : i64, tpu.core_type = #tpu.core_type<tc>, window_params = [{transform_indices = @transform_0, window_bounds = array<i64: 8, 1600>}, {pipeline_mode = #tpu.pipeline_mode<synchronous>, transform_indices = @transform_1, window_bounds = array<i64: 1600, 256>}, {pipeline_mode = #tpu.pipeline_mode<synchronous>, transform_indices = @transform_2, window_bounds = array<i64: 1, 256>}, {pipeline_mode = #tpu.pipeline_mode<synchronous>, transform_indices = @transform_3, window_bounds = array<i64: 256, 128>}, {pipeline_mode = #tpu.pipeline_mode<synchronous>, transform_indices = @transform_4, window_bounds = array<i64: 1, 128>}, {transform_indices = @transform_5, window_bounds = array<i64: 8, 128>}]} {
    %c0 = arith.constant 0 : index
    %c0_0 = arith.constant 0 : index
    %0 = vector.load %arg2[%c0, %c0_0] : memref<1600x256xbf16, #tpu.memory_space<vmem>>, vector<1600x256xbf16>
    %c0_1 = arith.constant 0 : index
    %c0_2 = arith.constant 0 : index
    %1 = vector.load %arg1[%c0_1, %c0_2] : memref<8x1600xf32, #tpu.memory_space<vmem>>, vector<8x1600xf32>
    %2 = arith.truncf %1 : vector<8x1600xf32> to vector<8x1600xbf16>
    %cst = arith.constant dense<0.000000e+00> : vector<8x256xf32>
    %3 = tpu.matmul %2, %0, %cst {dimension_numbers = #tpu.dot_dimension_numbers<[1], [0], [0], [1], [0, 0, 1, 1], [], []>} : vector<8x1600xbf16>, vector<1600x256xbf16>, vector<8x256xf32> -> vector<8x256xf32>
    %c0_3 = arith.constant 0 : index
    %c0_4 = arith.constant 0 : index
    %4 = vector.load %arg3[%c0_3, %c0_4] : memref<1x256xf32, #tpu.memory_space<vmem>>, vector<1x256xf32>
    %5 = vector.broadcast %4 : vector<1x256xf32> to vector<8x256xf32>
    %6 = arith.addf %3, %5 : vector<8x256xf32>
    %cst_5 = arith.constant 0.000000e+00 : f32
    %7 = vector.broadcast %cst_5 : f32 to vector<8x256xf32>
    %8 = arith.maximumf %6, %7 : vector<8x256xf32>
    %c0_6 = arith.constant 0 : index
    %c0_7 = arith.constant 0 : index
    %9 = vector.load %arg4[%c0_6, %c0_7] : memref<256x128xf32, #tpu.memory_space<vmem>>, vector<256x128xf32>
    %cst_8 = arith.constant dense<0.000000e+00> : vector<8x128xf32>
    %10 = tpu.matmul %8, %9, %cst_8 {dimension_numbers = #tpu.dot_dimension_numbers<[1], [0], [0], [1], [0, 0, 1, 1], [], []>} : vector<8x256xf32>, vector<256x128xf32>, vector<8x128xf32> -> vector<8x128xf32>
    %c0_9 = arith.constant 0 : index
    %c0_10 = arith.constant 0 : index
    %11 = vector.load %arg5[%c0_9, %c0_10] : memref<1x128xf32, #tpu.memory_space<vmem>>, vector<1x128xf32>
    %12 = vector.broadcast %11 : vector<1x128xf32> to vector<8x128xf32>
    %13 = arith.addf %10, %12 : vector<8x128xf32>
    %c0_11 = arith.constant 0 : index
    %c0_12 = arith.constant 0 : index
    %14 = vector.load %arg6[%c0_11, %c0_12] : memref<8x128xf32, #tpu.memory_space<vmem>>, vector<8x128xf32>
    tpu.vector_store %arg6[%c0_11, %c0_12], %13 {strides = array<i32>} : memref<8x128xf32, #tpu.memory_space<vmem>>, vector<8x128xf32>,
    return
  }
  func.func @transform_0(%arg0: i32) -> (i32, i32) {
    %c0_i32 = arith.constant 0 : i32
    %c0_i32_0 = arith.constant 0 : i32
    return %arg0, %c0_i32 : i32, i32
  }
  func.func @transform_1(%arg0: i32) -> (i32, i32) {
    %c0_i32 = arith.constant 0 : i32
    %c0_i32_0 = arith.constant 0 : i32
    %c0_i32_1 = arith.constant 0 : i32
    return %c0_i32, %c0_i32_0 : i32, i32
  }
  func.func @transform_2(%arg0: i32) -> (i32, i32) {
    %c0_i32 = arith.constant 0 : i32
    %c0_i32_0 = arith.constant 0 : i32
    %c0_i32_1 = arith.constant 0 : i32
    return %c0_i32, %c0_i32_0 : i32, i32
  }
  func.func @transform_3(%arg0: i32) -> (i32, i32) {
    %c0_i32 = arith.constant 0 : i32
    %c0_i32_0 = arith.constant 0 : i32
    %c0_i32_1 = arith.constant 0 : i32
    return %c0_i32, %c0_i32_0 : i32, i32
  }
  func.func @transform_4(%arg0: i32) -> (i32, i32) {
    %c0_i32 = arith.constant 0 : i32
    %c0_i32_0 = arith.constant 0 : i32
    %c0_i32_1 = arith.constant 0 : i32
    return %c0_i32, %c0_i32_0 : i32, i32
  }
  func.func @transform_5(%arg0: i32) -> (i32, i32) {
    %c0_i32 = arith.constant 0 : i32
    %c0_i32_0 = arith.constant 0 : i32
    return %arg0, %c0_i32 : i32, i32
  }
}

</mosaic_0001>

<bundles_post_ra>
// kernel: cnn_forward.3
= control target key start
LH: loop header
LB: loop body
LE: loop exit
PB: predicated region body
PF: predicated region fallthrough
CT: control target
= control target key end

     0   :  { %s1858_s12 = smov 0   ;;  %s2222_s0 = inlined_call_operand.vmem [shape: bf16[1600,25], index: 0, kind: input, shape index: {}]   ;;  %s2223_s1 = inlined_call_operand.vmem [shape: bf16[25,32], index: 1, kind: input, shape index: {}]   ;;  %s2224_s2 = inlined_call_operand.vmem [shape: f32[1,32], index: 2, kind: input, shape index: {}]   ;;  %s2225_s3 = inlined_call_operand.vmem [shape: bf16[400,32], index: 3, kind: output, shape index: {}]  }
   0x1 LB: > { %s1446_s13 = sadd.s32 4294967295, %s1835_s12   ;;  %p1450_p0 = scmp.ge.s32.totalorder %s1835_s12, 1  ;;  %s1835_s12 = sphi %s1858_s12, %s13_s12  }
   0x2   : > { %p138_p1 = scmp.lt.s32.totalorder %s1835_s12, 3 }
   0x4   : > { %p139_p2 = pnand %p1450_p0, %p138_p1 }
   0x6   : > { %142 = sbr.rel (%p139_p2) target bundleno = 331 (0x14b), region = 32 }
   0xb   : > { %v1777_v0 = vld [vmem:[%s2223_s1 + $0x8] sm:$0x1f]   ;;  %vm691_vm0 = vcmask 1043456   ;;  %vm692_vm1 = vcmask 1044480   ;;  %v1837_v1 = vmov 65535   ;;  %s162_s16 = smul.u32 100, %s1446_s13 }
   0xc   : > { %v693_v2 = vsel %vm691_vm0, 4294967295, %v1837_v1  ;;  %v1778_v5 = vld [vmem:[%s2223_s1] sm:$0xff]   ;;  %vm540_vm2 = vcmask 203776   ;;  %s168_s23 = smul.u32 25, %s1446_s13  ;;  %vm1364_vm3 = vcmask 257024  }
   0xd   : > { %v694_v3 = vsel %vm692_vm1, %v693_v2, 0  ;;  %p163_p3 = scmp.lt.s32.totalorder %s162_s16, 199 }
   0xe   : > { %v696_v4 = vand.u32 %v1777_v0, %v694_v3  ;;  %p169_p4 = scmp.lt.s32.totalorder %s168_s23, 49 }
   0xf   : > { %s2241_s16 = smov (!%p163_p3, %s162_s16), 199 }
  0x10   : > { %1660 = vmatprep.subr.bf16.mxu0 %v696_v4  ;;  %1764 = vmatprep.subr.bf16.mxu1 %v696_v4  ;;  %s1451_s19 = sshll.u32 %s2241_s16, 2  ;;  %s2243_s23 = smov (!%p169_p4, %s168_s23), 49 }
  0x11   : > { %1661 = vmatpush3.bf16.msra.mxu0 %v696_v4  ;;  %1766 = vmatpush3.bf16.msra.mxu1 %v696_v4  ;;  %s1877_s22 = scalar_lea.vmem %s2222_s0, %s1451_s19  ;;  %s1452_s26 = sshll.u32 %s2243_s23, 2 }
  0x12   : > { %1662 = vmatprep.subr.bf16.mxu0 %v1778_v5  ;;  %1765 = vmatprep.subr.bf16.mxu1 %v1778_v5  ;;  %v1779_v6 = vld [vmem:[%s1877_s22] sm:$0xff]   ;;  %v1780_v7 = vld [vmem:[%s1877_s22 + $0xd0] sm:$0xff]   ;;  %v1781_v8 = vld [vmem:[%s1877_s22 + $0x8] sm:$0xff]   ;;  %s2098_s29 = scalar_lea.vmem %s2225_s3, %s1452_s26 }
  0x13   : > { %1664 = vmatprep.mubr.msk.bf16.mxu0 %vm540_vm2, %v1779_v6  ;;  %1716 = vmatprep.mubr.msk.bf16.mxu1 %vm540_vm2, %v1780_v7  ;;  %v1782_v9 = vld [vmem:[%s1877_s22 + $0xd8] sm:$0xff]   ;;  %v1783_v10 = vld [vmem:[%s1877_s22 + $0x10] sm:$0xff]   ;;  %v1784_v11 = vld [vmem:[%s1877_s22 + $0xe0] sm:$0xff]  }
  0x14   : > { %v1785_v12 = vld [vmem:[%s1877_s22 + $0x18] sm:$0xff]   ;;  %v1786_v13 = vld [vmem:[%s1877_s22 + $0xe8] sm:$0xff]   ;;  %v1787_v14 = vld [vmem:[%s1877_s22 + $0x20] sm:$0xff]  }
  0x15   : > { %1663 = vmatpush3.bf16.msra.mxu0 %v1778_v5  ;;  %1767 = vmatpush3.bf16.msra.mxu1 %v1778_v5  ;;  %v1788_v15 = vld [vmem:[%s1877_s22 + $0xf0] sm:$0xff]   ;;  %v1789_v16 = vld [vmem:[%s1877_s22 + $0x28] sm:$0xff]   ;;  %v1790_v17 = vld [vmem:[%s1877_s22 + $0xf8] sm:$0xff]  }
  0x16   : > { %v1791_v18 = vld [vmem:[%s1877_s22 + $0x30] sm:$0xff]   ;;  %v1792_v19 = vld [vmem:[%s1877_s22 + $0x100] sm:$0xff]   ;;  %v1793_v20 = vld [vmem:[%s1877_s22 + $0x38] sm:$0xff]  }
  0x17   : > { %v1794_v21 = vld [vmem:[%s1877_s22 + $0x108] sm:$0xff]   ;;  %v1795_v22 = vld [vmem:[%s1877_s22 + $0x40] sm:$0xff]   ;;  %v1796_v23 = vld [vmem:[%s1877_s22 + $0x110] sm:$0xff]  }
  0x18   : > { %1665 = vmatmul.mubr.msk.bf16.vlgmr.msra.gmra.mxu0 %vm540_vm2, %v1781_v8  ;;  %1717 = vmatmul.mubr.msk.bf16.vlgmr.msra.gmra.mxu1 %vm540_vm2, %v1782_v9  ;;  %v1797_v24 = vld [vmem:[%s1877_s22 + $0x48] sm:$0xff]   ;;  %v1798_v25 = vld [vmem:[%s1877_s22 + $0x118] sm:$0xff]   ;;  %v1799_v26 = vld [vmem:[%s1877_s22 + $0x50] sm:$0xff]  }
  0x19   : > { %1668 = vmatprep.mubr.msk.bf16.mxu0 %vm540_vm2, %v1783_v10  ;;  %1720 = vmatprep.mubr.msk.bf16.mxu1 %vm540_vm2, %v1784_v11  ;;  %v1800_v27 = vld [vmem:[%s1877_s22 + $0x120] sm:$0xff]   ;;  %v1801_v28 = vld [vmem:[%s1877_s22 + $0x58] sm:$0xff]   ;;  %v1802_v29 = vld [vmem:[%s1877_s22 + $0x128] sm:$0xff]  }
  0x1a   : > { %v1803_v30 = vld [vmem:[%s1877_s22 + $0x60] sm:$0xff]   ;;  %v1804_v31 = vld [vmem:[%s1877_s22 + $0x130] sm:$0xff]   ;;  %v1805_v32 = vld [vmem:[%s1877_s22 + $0x68] sm:$0xff]  }
  0x1b   : > { %v1806_v33 = vld [vmem:[%s1877_s22 + $0x138] sm:$0xff]   ;;  %v1807_v34 = vld [vmem:[%s1877_s22 + $0x70] sm:$0xff]   ;;  %v1808_v35 = vld [vmem:[%s1877_s22 + $0x140] sm:$0xff]  }
  0x1c   : > { %v1809_v36 = vld [vmem:[%s1877_s22 + $0x78] sm:$0xff]   ;;  %v1810_v37 = vld [vmem:[%s1877_s22 + $0x148] sm:$0xff]   ;;  %v1811_v38 = vld [vmem:[%s1877_s22 + $0x80] sm:$0xff]  }
  0x1d   : > { %v1812_v39 = vld [vmem:[%s1877_s22 + $0x150] sm:$0xff]   ;;  %v1813_v40 = vld [vmem:[%s1877_s22 + $0x88] sm:$0xff]   ;;  %v1814_v41 = vld [vmem:[%s1877_s22 + $0x158] sm:$0xff]  }
  0x1e   : > { %v1815_v42 = vld [vmem:[%s1877_s22 + $0x90] sm:$0xff]   ;;  %v1816_v43 = vld [vmem:[%s1877_s22 + $0x160] sm:$0xff]   ;;  %v1817_v44 = vld [vmem:[%s1877_s22 + $0x98] sm:$0xff]  }
  0x1f   : > { %v1818_v45 = vld [vmem:[%s1877_s22 + $0x168] sm:$0xff]   ;;  %v1819_v46 = vld [vmem:[%s1877_s22 + $0xa0] sm:$0xff]   ;;  %v1820_v47 = vld [vmem:[%s1877_s22 + $0x170] sm:$0xff]  }
  0x20   : > { %1669 = vmatmul.mubr.msk.bf16.gmra.mxu0 %vm540_vm2, %v1785_v12  ;;  %1721 = vmatmul.mubr.msk.bf16.gmra.mxu1 %vm540_vm2, %v1786_v13  ;;  %v1821_v48 = vld [vmem:[%s1877_s22 + $0xa8] sm:$0xff]   ;;  %v1822_v49 = vld [vmem:[%s1877_s22 + $0x178] sm:$0xff]   ;;  %v1823_v50 = vld [vmem:[%s1877_s22 + $0xb0] sm:$0xff]  }
  0x21   : > { %1672 = vmatprep.mubr.msk.bf16.mxu0 %vm540_vm2, %v1787_v14  ;;  %1724 = vmatprep.mubr.msk.bf16.mxu1 %vm540_vm2, %v1788_v15  ;;  %v1824_v51 = vld [vmem:[%s1877_s22 + $0x180] sm:$0xff]   ;;  %v1825_v52 = vld [vmem:[%s1877_s22 + $0xb8] sm:$0xff]   ;;  %v1826_v53 = vld [vmem:[%s1877_s22 + $0x188] sm:$0xff]  }
  0x22   : > { %v1827_v54 = vld [vmem:[%s1877_s22 + $0xc0] sm:$0xff]   ;;  %v1828_v55 = vld [vmem:[%s1877_s22 + $0xc8] sm:$0xff]  }
  0x28   : > { %1673 = vmatmul.mubr.msk.bf16.gmra.mxu0 %vm540_vm2, %v1789_v16  ;;  %1725 = vmatmul.mubr.msk.bf16.gmra.mxu1 %vm540_vm2, %v1790_v17 }
  0x29   : > { %1676 = vmatprep.mubr.msk.bf16.mxu0 %vm540_vm2, %v1791_v18  ;;  %1728 = vmatprep.mubr.msk.bf16.mxu1 %vm540_vm2, %v1792_v19 }
  0x30   : > { %1677 = vmatmul.mubr.msk.bf16.gmra.mxu0 %vm540_vm2, %v1793_v20  ;;  %1729 = vmatmul.mubr.msk.bf16.gmra.mxu1 %vm540_vm2, %v1794_v21 }
  0x31   : > { %1680 = vmatprep.mubr.msk.bf16.mxu0 %vm540_vm2, %v1795_v22  ;;  %1732 = vmatprep.mubr.msk.bf16.mxu1 %vm540_vm2, %v1796_v23 }
  0x38   : > { %1681 = vmatmul.mubr.msk.bf16.gmra.mxu0 %vm540_vm2, %v1797_v24  ;;  %1733 = vmatmul.mubr.msk.bf16.gmra.mxu1 %vm540_vm2, %v1798_v25 }
  0x39   : > { %1684 = vmatprep.mubr.msk.bf16.mxu0 %vm540_vm2, %v1799_v26  ;;  %1736 = vmatprep.mubr.msk.bf16.mxu1 %vm540_vm2, %v1800_v27 }
  0x40   : > { %1685 = vmatmul.mubr.msk.bf16.gmra.mxu0 %vm540_vm2, %v1801_v28  ;;  %1737 = vmatmul.mubr.msk.bf16.gmra.mxu1 %vm540_vm2, %v1802_v29 }
  0x41   : > { %1688 = vmatprep.mubr.msk.bf16.mxu0 %vm540_vm2, %v1803_v30  ;;  %1740 = vmatprep.mubr.msk.bf16.mxu1 %vm540_vm2, %v1804_v31 }
  0x48   : > { %1689 = vmatmul.mubr.msk.bf16.gmra.mxu0 %vm540_vm2, %v1805_v32  ;;  %1741 = vmatmul.mubr.msk.bf16.gmra.mxu1 %vm540_vm2, %v1806_v33 }
  0x49   : > { %1692 = vmatprep.mubr.msk.bf16.mxu0 %vm540_vm2, %v1807_v34  ;;  %1744 = vmatprep.mubr.msk.bf16.mxu1 %vm540_vm2, %v1808_v35 }
  0x50   : > { %1693 = vmatmul.mubr.msk.bf16.gmra.mxu0 %vm540_vm2, %v1809_v36  ;;  %1745 = vmatmul.mubr.msk.bf16.gmra.mxu1 %vm540_vm2, %v1810_v37 }
  0x51   : > { %1696 = vmatprep.mubr.msk.bf16.mxu0 %vm540_vm2, %v1811_v38  ;;  %1748 = vmatprep.mubr.msk.bf16.mxu1 %vm540_vm2, %v1812_v39 }
  0x58   : > { %1697 = vmatmul.mubr.msk.bf16.gmra.mxu0 %vm540_vm2, %v1813_v40  ;;  %1749 = vmatmul.mubr.msk.bf16.gmra.mxu1 %vm540_vm2, %v1814_v41 }
  0x59   : > { %1700 = vmatprep.mubr.msk.bf16.mxu0 %vm540_vm2, %v1815_v42  ;;  %1752 = vmatprep.mubr.msk.bf16.mxu1 %vm540_vm2, %v1816_v43 }
  0x60   : > { %1701 = vmatmul.mubr.msk.bf16.gmra.mxu0 %vm540_vm2, %v1817_v44  ;;  %1753 = vmatmul.mubr.msk.bf16.gmra.mxu1 %vm540_vm2, %v1818_v45 }
  0x61   : > { %1704 = vmatprep.mubr.msk.bf16.mxu0 %vm540_vm2, %v1819_v46  ;;  %1756 = vmatprep.mubr.msk.bf16.mxu1 %vm540_vm2, %v1820_v47 }
  0x68   : > { %1705 = vmatmul.mubr.msk.bf16.gmra.mxu0 %vm540_vm2, %v1821_v48  ;;  %1757 = vmatmul.mubr.msk.bf16.gmra.mxu1 %vm540_vm2, %v1822_v49 }
  0x69   : > { %1708 = vmatprep.mubr.msk.bf16.mxu0 %vm540_vm2, %v1823_v50  ;;  %1760 = vmatprep.mubr.msk.bf16.mxu1 %vm540_vm2, %v1824_v51  ;;  %v2087_v51 = vld [vmem:[%s2224_s2] ss:$0 sm:$0xff] }
  0x70   : > { %1709 = vmatmul.mubr.msk.bf16.gmra.mxu0 %vm540_vm2, %v1825_v52  ;;  %1761 = vmatmul.mubr.msk.bf16.gmra.mxu1 %vm540_vm2, %v1826_v53 }
  0x71   : > { %1712 = vmatprep.mubr.msk.bf16.mxu0 %vm540_vm2, %v1827_v54 }
  0x78   : > { %1713 = vmatmul.mubr.msk.bf16.gmra.mxu0 %vm540_vm2, %v1828_v55 }
  0xd8   : > { %v1979_v56 = vpop.f32.mrf.mxu0  ;;  %v1981_v57 = vpop.f32.mrf.mxu1 }
  0xda   : > { %v1983_v58 = vpop.f32.mrf.mxu0  ;;  %v940_v59 = vpop.f32.mrf.mxu1 }
  0xdc   : > { %v1985_v60 = vpop.f32.mrf.mxu0  ;;  %v1987_v61 = vpop.f32.mrf.mxu1 }
  0xde   : > { %v1989_v62 = vpop.f32.mrf.mxu0  ;;  %v1991_v63 = vpop.f32.mrf.mxu1 }
  0xdf   : > { %2226 = vst [vmem:[#allocation2_spill] sm:$0xff] %v1989_v62 }
  0xe0   : > { %v1993_v0 = vpop.f32.mrf.mxu0  ;;  %v1995_v1 = vpop.f32.mrf.mxu1 }
  0xe2   : > { %v1997_v2 = vpop.f32.mrf.mxu0  ;;  %v1999_v3 = vpop.f32.mrf.mxu1 }
  0xe4   : > { %v2001_v4 = vpop.f32.mrf.mxu0  ;;  %v2003_v5 = vpop.f32.mrf.mxu1 }
  0xe6   : > { %v2005_v6 = vpop.f32.mrf.mxu0  ;;  %v2007_v7 = vpop.f32.mrf.mxu1 }
  0xe8   : > { %v2009_v8 = vpop.f32.mrf.mxu0  ;;  %v2011_v9 = vpop.f32.mrf.mxu1 }
  0xea   : > { %v2013_v10 = vpop.f32.mrf.mxu0  ;;  %v2015_v11 = vpop.f32.mrf.mxu1 }
  0xec   : > { %v2017_v12 = vpop.f32.mrf.mxu0  ;;  %v2019_v13 = vpop.f32.mrf.mxu1 }
  0xee   : > { %v2021_v14 = vpop.f32.mrf.mxu0  ;;  %v2023_v15 = vpop.f32.mrf.mxu1 }
  0xf0   : > { %v2025_v16 = vpop.f32.mrf.mxu0  ;;  %v2027_v17 = vpop.f32.mrf.mxu1 }
  0xf2   : > { %v2029_v18 = vpop.f32.mrf.mxu0  ;;  %v2031_v19 = vpop.f32.mrf.mxu1 }
  0xf4   : > { %v2033_v20 = vpop.f32.mrf.mxu0  ;;  %v2035_v21 = vpop.f32.mrf.mxu1 }
  0xf6   : > { %v2037_v22 = vpop.f32.mrf.mxu0  ;;  %v2039_v23 = vpop.f32.mrf.mxu1 }
  0xf8   : > { %v2041_v24 = vpop.f32.mrf.mxu0  ;;  %v2043_v25 = vpop.f32.mrf.mxu1 }
  0xfa   : > { %v2045_v26 = vpop.f32.mrf.mxu0  ;;  %v2047_v27 = vpop.f32.mrf.mxu1 }
  0xfc   : > { %v2049_v28 = vpop.f32.mrf.mxu0  ;;  %v2051_v29 = vpop.f32.mrf.mxu1 }
  0xfe   : > { %v2053_v30 = vpop.f32.mrf.mxu0  ;;  %v2055_v31 = vpop.f32.mrf.mxu1 }
 0x100   : > { %v2057_v32 = vpop.f32.mrf.mxu0  ;;  %v2059_v33 = vpop.f32.mrf.mxu1 }
 0x101   : > { %2227 = vst [vmem:[#allocation3_spill] sm:$0xff] %v2059_v33 }
 0x102   : > { %v2061_v34 = vpop.f32.mrf.mxu0  ;;  %v2063_v35 = vpop.f32.mrf.mxu1 }
 0x104   : > { %v2065_v36 = vpop.f32.mrf.mxu0  ;;  %v2067_v37 = vpop.f32.mrf.mxu1 }
 0x105   : > { %2228 = vst [vmem:[#allocation4_spill] sm:$0xff] %v2065_v36 }
 0x106   : > { %v2069_v38 = vpop.f32.mrf.mxu0  ;;  %v2071_v39 = vpop.f32.mrf.mxu1 }
 0x107   : > { %2229 = vst [vmem:[#allocation5_spill] sm:$0xff] %v2071_v39 }
 0x108   : > { %v2073_v40 = vpop.f32.mrf.mxu0  ;;  %v1742_v41 = vpop.f32.mrf.mxu1 }
 0x109   : > { %2230 = vst [vmem:[#allocation6_spill] sm:$0xff] %v2073_v40  ;;  %v1160_v55 = vmax.f32 %v1991_v63, %v1742_v41 }
 0x10a   : > { %v2077_v42 = vpop.f32.mrf.mxu0  ;;  %v2079_v43 = vpop.f32.mrf.mxu1 }
 0x10b   : > { %2231 = vst [vmem:[#allocation7_spill] sm:$0xff] %v2077_v42  ;;  %2232 = vst [vmem:[#allocation8_spill] sm:$0xff] %v2079_v43 }
 0x10c   : > { %v1691_v44 = vpop.f32.mrf.mxu0  ;;  %v1743_v45 = vpop.f32.mrf.mxu1 }
 0x10d   : > { %v1134_v48 = vmax.f32 %v1979_v56, %v1691_v44 }
 0x10e   : > { %v2081_v46 = vpop.f32.mrf.mxu0  ;;  %v1039_v47 = vpop.f32.mrf.mxu1 }
 0x10f   : > { %v1159_v49 = vmax.f32 %v940_v59, %v1039_v47 }
 0x110   : > { %v1694_v50 = vpop.f32.mrf.mxu0  ;;  %v1746_v52 = vpop.f32.mrf.mxu1 }
 0x111   : > { %v1184_v53 = vmax.f32 %v1134_v48, %v1159_v49  ;;  %v1137_v56 = vmax.f32 %v2005_v6, %v1694_v50  ;;  %v1161_v48 = vmax.f32 %v1981_v57, %v1743_v45 }
 0x112   : > { %v844_v54 = vpop.f32.mrf.mxu0  ;;  %v1052_v33 = vpop.f32.mrf.mxu1 }
 0x113   : > { %v1135_v42 = vmax.f32 %v1985_v60, %v844_v54  ;;  %v1215_v43 = vadd.f32 %v2087_v51, %v1184_v53  ;;  %v1162_v59 = vmax.f32 %v1987_v61, %v1052_v33 }
 0x114   : > { %v1695_v44 = vpop.f32.mrf.mxu0  ;;  %v1747_v62 = vpop.f32.mrf.mxu1 }
 0x115   : > { %v1185_v47 = vmax.f32 %v1135_v42, %v1160_v55  ;;  %v1240_v40 = vmax.f32 %v1215_v43, 0.0  ;;  %v1187_v36 = vmax.f32 %v1137_v56, %v1162_v59  ;;  %v1138_v41 = vmax.f32 %v1993_v0, %v1695_v44 }
 0x116   : > { %v847_v39 = vpop.f32.mrf.mxu0  ;;  %v1055_v61 = vpop.f32.mrf.mxu1 }
 0x117   : > { %v1216_v60 = vadd.f32 %v2087_v51, %v1185_v47  ;;  %v1136_v63 = vmax.f32 %v1997_v2, %v847_v39  ;;  %v1585_v6 = vpack.c.bf16 %v1240_v40, %v1240_v40  ;;  %v1218_v33 = vadd.f32 %v2087_v51, %v1187_v36 }
 0x118   : > { %v1163_v42 = vmax.f32 %v1999_v3, %v1055_v61  ;;  %v1698_v57 = vpop.f32.mrf.mxu0  ;;  %v1750_v49 = vpop.f32.mrf.mxu1  ;;  %v1164_v2 = vmax.f32 %v2007_v7, %v1746_v52 }
 0x119   : > { %v1241_v43 = vmax.f32 %v1216_v60, 0.0  ;;  %v1186_v45 = vmax.f32 %v1136_v63, %v1161_v48  ;;  %1367 = vst.msk [vmem:[%s2098_s29 + $0x8] sm:$0xf] %vm1364_vm3, %v1585_v6  ;;  %v1243_v50 = vmax.f32 %v1218_v33, 0.0  ;;  %v1141_v56 = vmax.f32 %v2021_v14, %v1698_v57 }
 0x11a   : > { %v1188_v53 = vmax.f32 %v1138_v41, %v1163_v42  ;;  %v860_v54 = vpop.f32.mrf.mxu0  ;;  %v1068_v40 = vpop.f32.mrf.mxu1  ;;  %v1165_v63 = vmax.f32 %v1995_v1, %v1747_v62 }
 0x11b   : > { %v1586_v39 = vpack.c.bf16 %v1241_v43, %v1241_v43  ;;  %v1217_v36 = vadd.f32 %v2087_v51, %v1186_v45  ;;  %v1139_v0 = vmax.f32 %v2001_v4, %v860_v54  ;;  %v1588_v3 = vpack.c.bf16 %v1243_v50, %v1243_v50 }
 0x11c   : > { %v1219_v55 = vadd.f32 %v2087_v51, %v1188_v53  ;;  %v1166_v59 = vmax.f32 %v2003_v5, %v1068_v40  ;;  %v1699_v44 = vpop.f32.mrf.mxu0  ;;  %v1751_v7 = vpop.f32.mrf.mxu1  ;;  %v1168_v54 = vmax.f32 %v2023_v15, %v1750_v49 }
 0x11d   : > { %1368 = vst.msk [vmem:[%s2098_s29 + $0xc] sm:$0xf] %vm1364_vm3, %v1586_v39  ;;  %v1242_v47 = vmax.f32 %v1217_v36, 0.0  ;;  %v1189_v48 = vmax.f32 %v1139_v0, %v1164_v2  ;;  %1370 = vst.msk [vmem:[%s2098_s29 + $0x14] sm:$0xf] %vm1364_vm3, %v1588_v3  ;;  %v1142_v42 = vmax.f32 %v2009_v8, %v1699_v44 }
 0x11e   : > { %v1244_v52 = vmax.f32 %v1219_v55, 0.0  ;;  %v1191_v60 = vmax.f32 %v1141_v56, %v1166_v59  ;;  %v863_v4 = vpop.f32.mrf.mxu0  ;;  %v1071_v6 = vpop.f32.mrf.mxu1 }
 0x11f   : > { %v1587_v61 = vpack.c.bf16 %v1242_v47, %v1242_v47  ;;  %v1220_v14 = vadd.f32 %v2087_v51, %v1189_v48  ;;  %v1140_v5 = vmax.f32 %v2013_v10, %v863_v4  ;;  %v1167_v57 = vmax.f32 %v2015_v11, %v1071_v6 }
 0x120   : > { %v1589_v33 = vpack.c.bf16 %v1244_v52, %v1244_v52  ;;  %v1222_v41 = vadd.f32 %v2087_v51, %v1191_v60  ;;  %v1702_v43 = vpop.f32.mrf.mxu0  ;;  %v1754_v62 = vpop.f32.mrf.mxu1  ;;  %v1169_v47 = vmax.f32 %v2011_v9, %v1751_v7 }
 0x121   : > { %1369 = vst.msk [vmem:[%s2098_s29 + $0x10] sm:$0xf] %vm1364_vm3, %v1587_v61  ;;  %v1245_v45 = vmax.f32 %v1220_v14, 0.0  ;;  %v1190_v50 = vmax.f32 %v1140_v5, %v1165_v63  ;;  %v1192_v53 = vmax.f32 %v1142_v42, %v1167_v57  ;;  %v1145_v40 = vmax.f32 %v2037_v22, %v1702_v43 }
 0x122   : > { %1371 = vst.msk [vmem:[%s2098_s29 + $0x18] sm:$0xf] %vm1364_vm3, %v1589_v33  ;;  %v1247_v1 = vmax.f32 %v1222_v41, 0.0  ;;  %v876_v10 = vpop.f32.mrf.mxu0  ;;  %v1084_v39 = vpop.f32.mrf.mxu1  ;;  %v1172_v41 = vmax.f32 %v2039_v23, %v1754_v62 }
 0x123   : > { %v1590_v2 = vpack.c.bf16 %v1245_v45, %v1245_v45  ;;  %v1221_v8 = vadd.f32 %v2087_v51, %v1190_v50  ;;  %v1143_v11 = vmax.f32 %v2017_v12, %v876_v10  ;;  %v1223_v0 = vadd.f32 %v2087_v51, %v1192_v53 }
 0x124   : > { %v1592_v36 = vpack.c.bf16 %v1247_v1, %v1247_v1  ;;  %v1170_v3 = vmax.f32 %v2019_v13, %v1084_v39  ;;  %v1703_v55 = vpop.f32.mrf.mxu0  ;;  %v1755_v15 = vpop.f32.mrf.mxu1 }
 0x125   : > { %1372 = vst.msk [vmem:[%s2098_s29 + $0x1c] sm:$0xf] %vm1364_vm3, %v1590_v2  ;;  %v1246_v56 = vmax.f32 %v1221_v8, 0.0  ;;  %v1193_v59 = vmax.f32 %v1143_v11, %v1168_v54  ;;  %v1248_v49 = vmax.f32 %v1223_v0, 0.0  ;;  %v1146_v63 = vmax.f32 %v2025_v16, %v1703_v55 }
 0x126   : > { %1374 = vst.msk [vmem:[%s2098_s29 + $0x24] sm:$0xf] %vm1364_vm3, %v1592_v36  ;;  %v1195_v44 = vmax.f32 %v1145_v40, %v1170_v3  ;;  %v879_v12 = vpop.f32.mrf.mxu0  ;;  %v1087_v52 = vpop.f32.mrf.mxu1  ;;  %v1173_v8 = vmax.f32 %v2027_v17, %v1755_v15 }
 0x127   : > { %v1591_v48 = vpack.c.bf16 %v1246_v56, %v1246_v56  ;;  %v1224_v22 = vadd.f32 %v2087_v51, %v1193_v59  ;;  %v1144_v13 = vmax.f32 %v2029_v18, %v879_v12  ;;  %v1593_v60 = vpack.c.bf16 %v1248_v49, %v1248_v49 }
 0x128   : > { %v1226_v4 = vadd.f32 %v2087_v51, %v1195_v44  ;;  %v1171_v61 = vmax.f32 %v2031_v19, %v1087_v52  ;;  %v1706_v14 = vpop.f32.mrf.mxu0  ;;  %v1758_v9 = vpop.f32.mrf.mxu1 }
 0x129   : > { %1373 = vst.msk [vmem:[%s2098_s29 + $0x20] sm:$0xf] %vm1364_vm3, %v1591_v48  ;;  %v1249_v5 = vmax.f32 %v1224_v22, 0.0  ;;  %v1194_v6 = vmax.f32 %v1144_v13, %v1169_v47  ;;  %1375 = vst.msk [vmem:[%s2098_s29 + $0x28] sm:$0xf] %vm1364_vm3, %v1593_v60  ;;  %v1149_v50 = vmax.f32 %v2053_v30, %v1706_v14  ;;  %v1176_v44 = vmax.f32 %v2055_v31, %v1758_v9 }
 0x12a   : > { %v1251_v7 = vmax.f32 %v1226_v4, 0.0  ;;  %v1196_v33 = vmax.f32 %v1146_v63, %v1171_v61  ;;  %v892_v18 = vpop.f32.mrf.mxu0  ;;  %v1100_v57 = vpop.f32.mrf.mxu1 }
 0x12b   : > { %v1594_v42 = vpack.c.bf16 %v1249_v5, %v1249_v5  ;;  %v1225_v16 = vadd.f32 %v2087_v51, %v1194_v6  ;;  %v1147_v19 = vmax.f32 %v2033_v20, %v892_v18  ;;  %v1174_v1 = vmax.f32 %v2035_v21, %v1100_v57 }
 0x12c   : > { %v1596_v43 = vpack.c.bf16 %v1251_v7, %v1251_v7  ;;  %v1227_v45 = vadd.f32 %v2087_v51, %v1196_v33  ;;  %v1707_v53 = vpop.f32.mrf.mxu0  ;;  %v1759_v23 = vpop.f32.mrf.mxu1 }
 0x12d   : > { %1376 = vst.msk [vmem:[%s2098_s29 + $0x2c] sm:$0xf] %vm1364_vm3, %v1594_v42  ;;  %v1250_v10 = vmax.f32 %v1225_v16, 0.0  ;;  %v1197_v54 = vmax.f32 %v1147_v19, %v1172_v41  ;;  %v1199_v2 = vmax.f32 %v1149_v50, %v1174_v1  ;;  %v1150_v40 = vmax.f32 %v2041_v24, %v1707_v53 }
 0x12e   : > { %1378 = vst.msk [vmem:[%s2098_s29 + $0x34] sm:$0xf] %vm1364_vm3, %v1596_v43  ;;  %v1252_v62 = vmax.f32 %v1227_v45, 0.0  ;;  %v895_v20 = vpop.f32.mrf.mxu0  ;;  %v1103_v39 = vpop.f32.mrf.mxu1  ;;  %v1177_v5 = vmax.f32 %v2043_v25, %v1759_v23  ;;  %v1132_v16 = vmax.f32 %v1983_v58, %v2081_v46  ;;  %v2234_v58 = vld [vmem:[#allocation4_spill] sm:$0xff] }
 0x12f   : > { %v1595_v11 = vpack.c.bf16 %v1250_v10, %v1250_v10  ;;  %v1228_v30 = vadd.f32 %v2087_v51, %v1197_v54  ;;  %v1148_v21 = vmax.f32 %v2045_v26, %v895_v20  ;;  %v1230_v0 = vadd.f32 %v2087_v51, %v1199_v2  ;;  %v2235_v10 = vld [vmem:[#allocation6_spill] sm:$0xff] }
 0x130   : > { %v1597_v36 = vpack.c.bf16 %v1252_v62, %v1252_v62  ;;  %v1175_v3 = vmax.f32 %v2047_v27, %v1103_v39  ;;  %v1710_v55 = vpop.f32.mrf.mxu0  ;;  %v1762_v17 = vpop.f32.mrf.mxu1  ;;  %v2236_v54 = vld [vmem:[#allocation2_spill] sm:$0xff] }
 0x131   : > { %1377 = vst.msk [vmem:[%s2098_s29 + $0x30] sm:$0xf] %vm1364_vm3, %v1595_v11  ;;  %v1253_v56 = vmax.f32 %v1228_v30, 0.0  ;;  %v1198_v59 = vmax.f32 %v1148_v21, %v1173_v8  ;;  %v1255_v15 = vmax.f32 %v1230_v0, 0.0  ;;  %v1153_v13 = vmax.f32 %v2069_v38, %v1710_v55  ;;  %v2237_v30 = vld [vmem:[#allocation8_spill] sm:$0xff] }
 0x132   : > { %1379 = vst.msk [vmem:[%s2098_s29 + $0x38] sm:$0xf] %vm1364_vm3, %v1597_v36  ;;  %v1200_v49 = vmax.f32 %v1150_v40, %v1175_v3  ;;  %v908_v26 = vpop.f32.mrf.mxu0  ;;  %v1116_v47 = vpop.f32.mrf.mxu1  ;;  %v1133_v23 = vmax.f32 %v2236_v54, %v2235_v10 }
 0x133   : > { %v1598_v12 = vpack.c.bf16 %v1253_v56, %v1253_v56  ;;  %v1229_v24 = vadd.f32 %v2087_v51, %v1198_v59  ;;  %v1151_v27 = vmax.f32 %v2049_v28, %v908_v26  ;;  %v1600_v48 = vpack.c.bf16 %v1255_v15, %v1255_v15  ;;  %v2238_v56 = vld [vmem:[#allocation3_spill] sm:$0xff] }
 0x134   : > { %v1231_v22 = vadd.f32 %v2087_v51, %v1200_v49  ;;  %v1178_v52 = vmax.f32 %v2051_v29, %v1116_v47  ;;  %v1711_v60 = vpop.f32.mrf.mxu0  ;;  %v1763_v61 = vpop.f32.mrf.mxu1  ;;  %v2239_v15 = vld [vmem:[#allocation7_spill] sm:$0xff] }
 0x135   : > { %1380 = vst.msk [vmem:[%s2098_s29 + $0x3c] sm:$0xf] %vm1364_vm3, %v1598_v12  ;;  %v1254_v4 = vmax.f32 %v1229_v24, 0.0  ;;  %v1201_v63 = vmax.f32 %v1151_v27, %v1176_v44  ;;  %1382 = vst.msk [vmem:[%s2098_s29 + $0x44] sm:$0xf] %vm1364_vm3, %v1600_v48  ;;  %v1154_v18 = vmax.f32 %v2057_v32, %v1711_v60  ;;  %v1181_v59 = vmax.f32 %v2238_v56, %v1763_v61 }
 0x136   : > { %v1256_v31 = vmax.f32 %v1231_v22, 0.0  ;;  %v1203_v14 = vmax.f32 %v1153_v13, %v1178_v52  ;;  %v911_v28 = vpop.f32.mrf.mxu0  ;;  %v1119_v9 = vpop.f32.mrf.mxu1 }
 0x137   : > { %v1599_v6 = vpack.c.bf16 %v1254_v4, %v1254_v4  ;;  %v1232_v38 = vadd.f32 %v2087_v51, %v1201_v63  ;;  %v1152_v29 = vmax.f32 %v2061_v34, %v911_v28  ;;  %v1179_v41 = vmax.f32 %v2063_v35, %v1119_v9  ;;  %v2233_v34 = vld [vmem:[#allocation5_spill] sm:$0xff] }
 0x138   : > { %v1601_v7 = vpack.c.bf16 %v1256_v31, %v1256_v31  ;;  %v1234_v33 = vadd.f32 %v2087_v51, %v1203_v14  ;;  %v1714_v42 = vpop.f32.mrf.mxu0  ;;  %v1180_v43 = vmax.f32 %v2233_v34, %v1762_v17 }
 0x139   : > { %1381 = vst.msk [vmem:[%s2098_s29 + $0x40] sm:$0xf] %vm1364_vm3, %v1599_v6  ;;  %v1257_v25 = vmax.f32 %v1232_v38, 0.0  ;;  %v1202_v19 = vmax.f32 %v1152_v29, %v1177_v5  ;;  %v1157_v57 = vmax.f32 %v1714_v42, %v2067_v37  ;;  %v1204_v32 = vmax.f32 %v1154_v18, %v1179_v41 }
 0x13a   : > { %1383 = vst.msk [vmem:[%s2098_s29 + $0x48] sm:$0xf] %vm1364_vm3, %v1601_v7  ;;  %v1259_v45 = vmax.f32 %v1234_v33, 0.0  ;;  %v924_v50 = vpop.f32.mrf.mxu0 }
 0x13b   : > { %v1602_v35 = vpack.c.bf16 %v1257_v25, %v1257_v25  ;;  %v1233_v1 = vadd.f32 %v2087_v51, %v1202_v19  ;;  %v1182_v53 = vmax.f32 %v1132_v16, %v1157_v57  ;;  %v1155_v46 = vmax.f32 %v2234_v58, %v924_v50 }
 0x13c   : > { %v1604_v62 = vpack.c.bf16 %v1259_v45, %v1259_v45  ;;  %v1235_v37 = vadd.f32 %v2087_v51, %v1204_v32  ;;  %v1715_v2 = vpop.f32.mrf.mxu0 }
 0x13d   : > { %1384 = vst.msk [vmem:[%s2098_s29 + $0x4c] sm:$0xf] %vm1364_vm3, %v1602_v35  ;;  %v1258_v20 = vmax.f32 %v1233_v1, 0.0  ;;  %v1213_v8 = vadd.f32 %v2087_v51, %v1182_v53  ;;  %v1205_v11 = vmax.f32 %v1155_v46, %v1180_v43  ;;  %v1158_v21 = vmax.f32 %v1715_v2, %v2237_v30 }
 0x13e   : > { %1386 = vst.msk [vmem:[%s2098_s29 + $0x54] sm:$0xf] %vm1364_vm3, %v1604_v62  ;;  %v1260_v39 = vmax.f32 %v1235_v37, 0.0  ;;  %v927_v36 = vpop.f32.mrf.mxu0 }
 0x13f   : > { %v1603_v0 = vpack.c.bf16 %v1258_v20, %v1258_v20  ;;  %v1238_v40 = vmax.f32 %v1213_v8, 0.0  ;;  %v1236_v3 = vadd.f32 %v2087_v51, %v1205_v11  ;;  %v1183_v55 = vmax.f32 %v1133_v23, %v1158_v21 }
 0x140   : > { %v1605_v17 = vpack.c.bf16 %v1260_v39, %v1260_v39  ;;  %v1156_v49 = vmax.f32 %v2239_v15, %v927_v36 }
 0x141   : > { %1385 = vst.msk [vmem:[%s2098_s29 + $0x50] sm:$0xf] %vm1364_vm3, %v1603_v0  ;;  %v1583_v26 = vpack.c.bf16 %v1238_v40, %v1238_v40  ;;  %v1261_v44 = vmax.f32 %v1236_v3, 0.0  ;;  %v1214_v12 = vadd.f32 %v2087_v51, %v1183_v55 }
 0x142   : > { %1387 = vst.msk [vmem:[%s2098_s29 + $0x58] sm:$0xf] %vm1364_vm3, %v1605_v17  ;;  %v1206_v24 = vmax.f32 %v1156_v49, %v1181_v59 }
 0x143   : > { %1365 = vst.msk [vmem:[%s2098_s29] sm:$0xf] %vm1364_vm3, %v1583_v26  ;;  %v1606_v27 = vpack.c.bf16 %v1261_v44, %v1261_v44  ;;  %v1239_v47 = vmax.f32 %v1214_v12, 0.0 }
 0x144   : > { %v1237_v48 = vadd.f32 %v2087_v51, %v1206_v24 }
 0x145   : > { %1388 = vst.msk [vmem:[%s2098_s29 + $0x5c] sm:$0xf] %vm1364_vm3, %v1606_v27  ;;  %v1584_v22 = vpack.c.bf16 %v1239_v47, %v1239_v47 }
 0x146   : > { %v1262_v13 = vmax.f32 %v1237_v48, 0.0 }
 0x147   : > { %1366 = vst.msk [vmem:[%s2098_s29 + $0x4] sm:$0xf] %vm1364_vm3, %v1584_v22 }
 0x148   : > { %v1607_v52 = vpack.c.bf16 %v1262_v13, %v1262_v13 }
 0x14a   : > { %1389 = vst.msk [vmem:[%s2098_s29 + $0x60] sm:$0xf] %vm1364_vm3, %v1607_v52 }
 0x14b PF: > { %s13_s12 = sadd.s32 1, %s1835_s12  }
 0x14c   : > { %p10_p5 = scmp.ge.s32.totalorder %s13_s12, 4  }
 0x14e   :  { %12 = sbr.rel (!%p10_p5) target bundleno = 1 (0x1), region = 62 }

// kernel: cnn_forward.4
= control target key start
LH: loop header
LB: loop body
LE: loop exit
PB: predicated region body
PF: predicated region fallthrough
CT: control target
= control target key end

     0   :  { %s1954_s12 = smov 0   ;;  %s2352_s0 = inlined_call_operand.vmem [shape: bf16[256,800], index: 0, kind: input, shape index: {}]   ;;  %s2353_s1 = inlined_call_operand.vmem [shape: bf16[800,64], index: 1, kind: input, shape index: {}]   ;;  %s2354_s2 = inlined_call_operand.vmem [shape: f32[1,64], index: 2, kind: input, shape index: {}]   ;;  %s2355_s3 = inlined_call_operand.vmem [shape: f32[64,64], index: 3, kind: output, shape index: {}]  }
   0x1 LB: > { %s1423_s13 = sadd.s32 4294967295, %s1932_s12   ;;  %p1427_p0 = scmp.ge.s32.totalorder %s1932_s12, 1  ;;  %s1932_s12 = sphi %s1954_s12, %s13_s12  }
   0x2   : > { %p139_p1 = scmp.lt.s32.totalorder %s1932_s12, 3 }
   0x4   : > { %p140_p2 = pnand %p1427_p0, %p139_p1 }
   0x6   : > { %143 = sbr.rel (%p140_p2) target bundleno = 363 (0x16b), region = 32 }
   0xb   : > { %v1796_v0 = vld [vmem:[%s2353_s1 + $0x78] sm:$0xff]   ;;  %v1800_v4 = vld [vmem:[%s2353_s1 + $0x70] sm:$0xff]   ;;  %v1804_v8 = vld [vmem:[%s2353_s1 + $0x68] sm:$0xff]   ;;  %s1428_s19 = sshll.u32 %s1423_s13, 4  ;;  %vm922_vm0 = vcmask 261120   ;;  %vm1362_vm1 = vcmask 523264  }
   0xc   : > { %v1797_v1 = vld [vmem:[%s2353_s1 + $0xf8] sm:$0xff]   ;;  %1549 = vmatprep.subr.bf16.mxu0 %v1796_v0  ;;  %v1801_v5 = vld [vmem:[%s2353_s1 + $0xf0] sm:$0xff]   ;;  %v1805_v9 = vld [vmem:[%s2353_s1 + $0xe8] sm:$0xff]   ;;  %p165_p3 = scmp.lt.s32.totalorder %s1428_s19, 31 }
   0xd   : > { %v1798_v2 = vld [vmem:[%s2353_s1 + $0x38] sm:$0xff]   ;;  %1613 = vmatprep.subr.bf16.mxu1 %v1797_v1  ;;  %v1802_v6 = vld [vmem:[%s2353_s1 + $0x30] sm:$0xff]   ;;  %v1806_v10 = vld [vmem:[%s2353_s1 + $0x28] sm:$0xff]  }
   0xe   : > { %v1799_v3 = vld [vmem:[%s2353_s1 + $0xb8] sm:$0xff]   ;;  %1550 = vmatpush3.bf16.msra.mxu0 %v1798_v2  ;;  %v1803_v7 = vld [vmem:[%s2353_s1 + $0xb0] sm:$0xff]   ;;  %v1807_v11 = vld [vmem:[%s2353_s1 + $0xa8] sm:$0xff]   ;;  %s2367_s19 = smov (!%p165_p3, %s1428_s19), 31 }
   0xf   : > { %1614 = vmatpush3.bf16.msra.mxu1 %v1799_v3  ;;  %1551 = vmatprep.subr.bf16.mxu0 %v1800_v4  ;;  %v1808_v12 = vld [vmem:[%s2353_s1 + $0x60] sm:$0xff]   ;;  %v1812_v16 = vld [vmem:[%s2353_s1 + $0x58] sm:$0xff]   ;;  %v1816_v20 = vld [vmem:[%s2353_s1 + $0x50] sm:$0xff]   ;;  %s1787_s17 = smul.u32 28, %s2367_s19 }
  0x10   : > { %1615 = vmatprep.subr.bf16.mxu1 %v1801_v5  ;;  %v1809_v13 = vld [vmem:[%s2353_s1 + $0xe0] sm:$0xff]   ;;  %v1813_v17 = vld [vmem:[%s2353_s1 + $0xd8] sm:$0xff]   ;;  %v1817_v21 = vld [vmem:[%s2353_s1 + $0xd0] sm:$0xff]  }
  0x11   : > { %v1810_v14 = vld [vmem:[%s2353_s1 + $0x20] sm:$0xff]   ;;  %v1814_v18 = vld [vmem:[%s2353_s1 + $0x18] sm:$0xff]   ;;  %v1818_v22 = vld [vmem:[%s2353_s1 + $0x10] sm:$0xff]   ;;  %s2057_s28 = scalar_lea.vmem %s2352_s0, %s1787_s17 }
  0x12   : > { %1552 = vmatpush3.bf16.msra.mxu0 %v1802_v6  ;;  %v1811_v15 = vld [vmem:[%s2353_s1 + $0xa0] sm:$0xff]   ;;  %v1815_v19 = vld [vmem:[%s2353_s1 + $0x98] sm:$0xff]   ;;  %v1819_v23 = vld [vmem:[%s2353_s1 + $0x90] sm:$0xff]  }
  0x13   : > { %1616 = vmatpush3.bf16.msra.mxu1 %v1803_v7  ;;  %1553 = vmatprep.subr.bf16.mxu0 %v1804_v8  ;;  %v1820_v24 = vld [vmem:[%s2353_s1 + $0x48] sm:$0xff]   ;;  %v1824_v28 = vld [vmem:[%s2353_s1 + $0x40] sm:$0xff]   ;;  %v1834_v36 = vld [vmem:[%s2353_s1 + $0x178] sm:$0xff]  }
  0x14   : > { %1617 = vmatprep.subr.bf16.mxu1 %v1805_v9  ;;  %v1821_v25 = vld [vmem:[%s2353_s1 + $0xc8] sm:$0xff]   ;;  %v1825_v29 = vld [vmem:[%s2353_s1 + $0xc0] sm:$0xff]   ;;  %v1835_v37 = vld [vmem:[%s2353_s1 + $0x138] sm:$0xff]  }
  0x15   : > { %v1822_v26 = vld [vmem:[%s2353_s1 + $0x8] sm:$0xff]   ;;  %v1826_v30 = vld [vmem:[%s2353_s1] sm:$0xff]   ;;  %v1836_v38 = vld [vmem:[%s2057_s28 + $0x3c] ss:$28 sps:$4 sm:$0xff]  }
  0x16   : > { %1554 = vmatpush3.bf16.msra.mxu0 %v1806_v10  ;;  %v1823_v27 = vld [vmem:[%s2353_s1 + $0x88] sm:$0xff]   ;;  %v1827_v31 = vld [vmem:[%s2353_s1 + $0x80] sm:$0xff]   ;;  %v1840_v40 = vld [vmem:[%s2057_s28 + $0x38] ss:$28 sps:$4 sm:$0xff]  }
  0x17   : > { %1618 = vmatpush3.bf16.msra.mxu1 %v1807_v11  ;;  %1555 = vmatprep.subr.bf16.mxu0 %v1808_v12  ;;  %v1828_v32 = vld [vmem:[%s2057_s28] ss:$28 sps:$4 sm:$0xff]   ;;  %v1831_v34 = vld [vmem:[%s2057_s28 + $0x8] ss:$28 sps:$4 sm:$0xff]   ;;  %v1842_v42 = vld [vmem:[%s2353_s1 + $0x170] sm:$0xff]  }
  0x18   : > { %1619 = vmatprep.subr.bf16.mxu1 %v1809_v13  ;;  %v1830_v33 = vld [vmem:[%s2057_s28 + $0x4] ss:$28 sps:$4 sm:$0xff]   ;;  %v1833_v35 = vld [vmem:[%s2057_s28 + $0xc] ss:$28 sps:$4 sm:$0xff]   ;;  %v1843_v43 = vld [vmem:[%s2353_s1 + $0x130] sm:$0xff]  }
  0x19   : > { %979 = vmatprep.mubr.bf16.mxu0 %v1830_v33  ;;  %1076 = vmatprep.mubr.bf16.mxu1 %v1833_v35  ;;  %v1838_v39 = vld [vmem:[%s2057_s28 + $0x44] ss:$28 sps:$4 sm:$0xff]   ;;  %v1844_v44 = vld [vmem:[%s2057_s28 + $0x74] ss:$28 sps:$4 sm:$0xff]   ;;  %v1846_v45 = vld [vmem:[%s2057_s28 + $0x7c] ss:$28 sps:$4 sm:$0xff]  }
  0x1a   : > { %1556 = vmatpush3.bf16.msra.mxu0 %v1810_v14  ;;  %v1841_v41 = vld [vmem:[%s2057_s28 + $0x40] ss:$28 sps:$4 sm:$0xff]   ;;  %v1850_v46 = vld [vmem:[%s2353_s1 + $0x168] sm:$0xff]   ;;  %v1849_v49 = vld [vmem:[%s2057_s28 + $0x78] ss:$28 sps:$4 sm:$0xff]  }
  0x1b   : > { %1620 = vmatpush3.bf16.msra.mxu1 %v1811_v15  ;;  %1557 = vmatprep.subr.bf16.mxu0 %v1812_v16  ;;  %v1851_v47 = vld [vmem:[%s2353_s1 + $0x128] sm:$0xff]   ;;  %v1854_v51 = vld [vmem:[%s2057_s28 + $0xb4] ss:$28 sps:$4 sm:$0xff]   ;;  %v1858_v52 = vld [vmem:[%s2353_s1 + $0x160] sm:$0xff]  }
  0x1c   : > { %1621 = vmatprep.subr.bf16.mxu1 %v1813_v17  ;;  %v1848_v48 = vld [vmem:[%s2057_s28 + $0x70] ss:$28 sps:$4 sm:$0xff]   ;;  %v1859_v53 = vld [vmem:[%s2353_s1 + $0x120] sm:$0xff]   ;;  %v1866_v54 = vld [vmem:[%s2353_s1 + $0x158] sm:$0xff]  }
  0x1d   : > { %v1852_v50 = vld [vmem:[%s2057_s28 + $0xac] ss:$28 sps:$4 sm:$0xff]   ;;  %v1867_v55 = vld [vmem:[%s2353_s1 + $0x118] sm:$0xff]   ;;  %v1860_v58 = vld [vmem:[%s2057_s28 + $0xe4] ss:$28 sps:$4 sm:$0xff]  }
  0x1e   : > { %1558 = vmatpush3.bf16.msra.mxu0 %v1814_v18  ;;  %v1856_v56 = vld [vmem:[%s2057_s28 + $0xa8] ss:$28 sps:$4 sm:$0xff]   ;;  %v1857_v57 = vld [vmem:[%s2057_s28 + $0xb0] ss:$28 sps:$4 sm:$0xff]   ;;  %v1864_v62 = vld [vmem:[%s2057_s28 + $0xe0] ss:$28 sps:$4 sm:$0xff]  }
  0x1f   : > { %1622 = vmatpush3.bf16.msra.mxu1 %v1815_v19  ;;  %1559 = vmatprep.subr.bf16.mxu0 %v1816_v20  ;;  %v1862_v59 = vld [vmem:[%s2057_s28 + $0xec] ss:$28 sps:$4 sm:$0xff]   ;;  %v1874_v60 = vld [vmem:[%s2353_s1 + $0x150] sm:$0xff]   ;;  %v1868_v2 = vld [vmem:[%s2057_s28 + $0x11c] ss:$28 sps:$4 sm:$0xff]  }
  0x20   : > { %1623 = vmatprep.subr.bf16.mxu1 %v1817_v21  ;;  %v1875_v61 = vld [vmem:[%s2353_s1 + $0x110] sm:$0xff]   ;;  %v1865_v63 = vld [vmem:[%s2057_s28 + $0xe8] ss:$28 sps:$4 sm:$0xff]   ;;  %v1873_v7 = vld [vmem:[%s2057_s28 + $0x120] ss:$28 sps:$4 sm:$0xff]  }
  0x21   : > { %v1882_v0 = vld [vmem:[%s2353_s1 + $0x148] sm:$0xff]   ;;  %v1870_v3 = vld [vmem:[%s2057_s28 + $0x124] ss:$28 sps:$4 sm:$0xff]   ;;  %v1872_v6 = vld [vmem:[%s2057_s28 + $0x118] ss:$28 sps:$4 sm:$0xff]  }
  0x22   : > { %1560 = vmatpush3.bf16.msra.mxu0 %v1818_v22  ;;  %v1883_v1 = vld [vmem:[%s2353_s1 + $0x108] sm:$0xff]   ;;  %v1890_v4 = vld [vmem:[%s2353_s1 + $0x140] sm:$0xff]   ;;  %v1876_v9 = vld [vmem:[%s2057_s28 + $0x154] ss:$28 sps:$4 sm:$0xff]  }
  0x23   : > { %1624 = vmatpush3.bf16.msra.mxu1 %v1819_v23  ;;  %1561 = vmatprep.subr.bf16.mxu0 %v1820_v24  ;;  %v1891_v5 = vld [vmem:[%s2353_s1 + $0x100] sm:$0xff]   ;;  %v1898_v8 = vld [vmem:[%s2353_s1 + $0x188] sm:$0xff]   ;;  %v1878_v10 = vld [vmem:[%s2057_s28 + $0x15c] ss:$28 sps:$4 sm:$0xff]  }
  0x24   : > { %1625 = vmatprep.subr.bf16.mxu1 %v1821_v25  ;;  %v1880_v11 = vld [vmem:[%s2057_s28 + $0x150] ss:$28 sps:$4 sm:$0xff]   ;;  %v1881_v12 = vld [vmem:[%s2057_s28 + $0x158] ss:$28 sps:$4 sm:$0xff]   ;;  %v1888_v15 = vld [vmem:[%s2057_s28 + $0x188] ss:$28 sps:$4 sm:$0xff]  }
  0x25   : > { %v1884_v13 = vld [vmem:[%s2057_s28 + $0x18c] ss:$28 sps:$4 sm:$0xff]   ;;  %v1886_v14 = vld [vmem:[%s2057_s28 + $0x194] ss:$28 sps:$4 sm:$0xff]   ;;  %v1897_v18 = vld [vmem:[%s2057_s28 + $0x164] ss:$28 sps:$4 sm:$0xff]  }
  0x26   : > { %1562 = vmatpush3.bf16.msra.mxu0 %v1822_v26  ;;  %v1889_v16 = vld [vmem:[%s2057_s28 + $0x190] ss:$28 sps:$4 sm:$0xff]   ;;  %v1895_v20 = vld [vmem:[%s2057_s28 + $0x160] ss:$28 sps:$4 sm:$0xff]   ;;  %v1903_v24 = vld [vmem:[%s2057_s28 + $0x48] ss:$28 sps:$4 sm:$0xff]  }
  0x27   : > { %1626 = vmatpush3.bf16.msra.mxu1 %v1823_v27  ;;  %1563 = vmatprep.subr.bf16.mxu0 %v1824_v28  ;;  %v1894_v17 = vld [vmem:[%s2057_s28 + $0x14] ss:$28 sps:$4 sm:$0xff]   ;;  %v1899_v21 = vld [vmem:[%s2057_s28 + $0x4c] ss:$28 sps:$4 sm:$0xff]   ;;  %v1901_v22 = vld [vmem:[%s2057_s28 + $0x19c] ss:$28 sps:$4 sm:$0xff]  }
  0x28   : > { %1627 = vmatprep.subr.bf16.mxu1 %v1825_v29  ;;  %v1892_v19 = vld [vmem:[%s2057_s28 + $0x10] ss:$28 sps:$4 sm:$0xff]   ;;  %v1905_v23 = vld [vmem:[%s2353_s1 + $0x180] sm:$0xff]   ;;  %v1904_v25 = vld [vmem:[%s2057_s28 + $0x198] ss:$28 sps:$4 sm:$0xff]  }
  0x29   : > { %v1906_v26 = vld [vmem:[%s2057_s28 + $0x84] ss:$28 sps:$4 sm:$0xff]   ;;  %v1908_v27 = vld [vmem:[%s2057_s28 + $0x18] ss:$28 sps:$4 sm:$0xff]   ;;  %v1910_v29 = vld [vmem:[%s2057_s28 + $0x50] ss:$28 sps:$4 sm:$0xff]  }
  0x2a   : > { %1564 = vmatpush3.bf16.msra.mxu0 %v1826_v30  ;;  %v1909_v28 = vld [vmem:[%s2057_s28 + $0x80] ss:$28 sps:$4 sm:$0xff]   ;;  %v1918_v35 = vld [vmem:[%s2057_s28 + $0xf8] ss:$28 sps:$4 sm:$0xff]  }
  0x2b   : > { %1628 = vmatpush3.bf16.msra.mxu1 %v1827_v31  ;;  %1677 = vmatprep.subr.bf16.mxu0 %v1834_v36  ;;  %v1911_v30 = vld [vmem:[%s2057_s28 + $0xbc] ss:$28 sps:$4 sm:$0xff]   ;;  %v1913_v31 = vld [vmem:[%s2057_s28 + $0x88] ss:$28 sps:$4 sm:$0xff]  }
  0x2c   : > { %1771 = vmatprep.subr.bf16.mxu1 %v1834_v36  ;;  %v1915_v33 = vld [vmem:[%s2057_s28 + $0xc0] ss:$28 sps:$4 sm:$0xff]   ;;  %v1919_v36 = vld [vmem:[%s2057_s28 + $0xf0] ss:$28 sps:$4 sm:$0xff]  }
  0x2d   : > { %980 = vmatmul.mubr.bf16.vlgmr.msra.gmra.mxu0 %v1828_v32  ;;  %v1914_v32 = vld [vmem:[%s2057_s28 + $0xb8] ss:$28 sps:$4 sm:$0xff]  }
  0x2e   : > { %1077 = vmatmul.mubr.bf16.vlgmr.msra.gmra.mxu1 %v1831_v34  ;;  %1678 = vmatpush3.bf16.msra.mxu0 %v1835_v37  ;;  %v1916_v34 = vld [vmem:[%s2057_s28 + $0xf4] ss:$28 sps:$4 sm:$0xff]  }
  0x2f   : > { %1779 = vmatpush3.bf16.msra.mxu1 %v1835_v37  ;;  %987 = vmatprep.mubr.bf16.mxu0 %v1836_v38  ;;  %v1920_v37 = vld [vmem:[%s2057_s28 + $0x130] ss:$28 sps:$4 sm:$0xff]  }
  0x30   : > { %1084 = vmatprep.mubr.bf16.mxu1 %v1838_v39  ;;  %1679 = vmatprep.subr.bf16.mxu0 %v1842_v42  ;;  %v1921_v38 = vld [vmem:[%s2057_s28 + $0x12c] ss:$28 sps:$4 sm:$0xff]  }
  0x31   : > { %1772 = vmatprep.subr.bf16.mxu1 %v1842_v42  ;;  %v1923_v39 = vld [vmem:[%s2057_s28 + $0x168] ss:$28 sps:$4 sm:$0xff]  }
  0x32   : > { %1680 = vmatpush3.bf16.msra.mxu0 %v1843_v43 }
  0x33   : > { %1780 = vmatpush3.bf16.msra.mxu1 %v1843_v43  ;;  %1681 = vmatprep.subr.bf16.mxu0 %v1850_v46 }
  0x34   : > { %1773 = vmatprep.subr.bf16.mxu1 %v1850_v46 }
  0x35   : > { %988 = vmatmul.mubr.bf16.gmra.mxu0 %v1840_v40  ;;  %v1924_v40 = vld [vmem:[%s2057_s28 + $0x128] ss:$28 sps:$4 sm:$0xff]  }
  0x36   : > { %1085 = vmatmul.mubr.bf16.gmra.mxu1 %v1841_v41  ;;  %995 = vmatprep.mubr.bf16.mxu0 %v1844_v44  ;;  %v1925_v41 = vld [vmem:[%s2057_s28 + $0x1a0] ss:$28 sps:$4 sm:$0xff]   ;;  %s1430_s28 = sshll.u32 %s1423_s13, 2 }
  0x37   : > { %1092 = vmatprep.mubr.bf16.mxu1 %v1846_v45  ;;  %1682 = vmatpush3.bf16.msra.mxu0 %v1851_v47  ;;  %p172_p4 = scmp.lt.s32.totalorder %s1430_s28, 7 }
  0x38   : > { %1781 = vmatpush3.bf16.msra.mxu1 %v1851_v47  ;;  %1683 = vmatprep.subr.bf16.mxu0 %v1858_v52 }
  0x39   : > { %1774 = vmatprep.subr.bf16.mxu1 %v1858_v52  ;;  %s2369_s28 = smov (!%p172_p4, %s1430_s28), 7 }
  0x3a   : > { %s1431_s22 = sshll.u32 %s2369_s28, 3 }
  0x3b   : > { %1684 = vmatpush3.bf16.msra.mxu0 %v1859_v53  ;;  %s175_s25 = scalar_lea.vmem %s2355_s3, %s1431_s22 }
  0x3c   : > { %1782 = vmatpush3.bf16.msra.mxu1 %v1859_v53  ;;  %1685 = vmatprep.subr.bf16.mxu0 %v1866_v54 }
  0x3d   : > { %996 = vmatmul.mubr.bf16.gmra.mxu0 %v1848_v48  ;;  %1775 = vmatprep.subr.bf16.mxu1 %v1866_v54 }
  0x3e   : > { %1093 = vmatmul.mubr.bf16.gmra.mxu1 %v1849_v49  ;;  %1003 = vmatprep.mubr.bf16.mxu0 %v1852_v50 }
  0x3f   : > { %1100 = vmatprep.mubr.bf16.mxu1 %v1854_v51  ;;  %1686 = vmatpush3.bf16.msra.mxu0 %v1867_v55 }
  0x40   : > { %1783 = vmatpush3.bf16.msra.mxu1 %v1867_v55  ;;  %1687 = vmatprep.subr.bf16.mxu0 %v1874_v60 }
  0x41   : > { %1776 = vmatprep.subr.bf16.mxu1 %v1874_v60 }
  0x43   : > { %1688 = vmatpush3.bf16.msra.mxu0 %v1875_v61 }
  0x44   : > { %1784 = vmatpush3.bf16.msra.mxu1 %v1875_v61  ;;  %1689 = vmatprep.subr.bf16.mxu0 %v1882_v0 }
  0x45   : > { %1004 = vmatmul.mubr.bf16.gmra.mxu0 %v1856_v56  ;;  %1777 = vmatprep.subr.bf16.mxu1 %v1882_v0 }
  0x46   : > { %1101 = vmatmul.mubr.bf16.gmra.mxu1 %v1857_v57  ;;  %1011 = vmatprep.mubr.bf16.mxu0 %v1860_v58 }
  0x47   : > { %1108 = vmatprep.mubr.bf16.mxu1 %v1862_v59  ;;  %1690 = vmatpush3.bf16.msra.mxu0 %v1883_v1 }
  0x48   : > { %1785 = vmatpush3.bf16.msra.mxu1 %v1883_v1  ;;  %1691 = vmatprep.subr.bf16.mxu0 %v1890_v4 }
  0x49   : > { %1778 = vmatprep.subr.bf16.mxu1 %v1890_v4 }
  0x4b   : > { %1692 = vmatpush3.bf16.msra.mxu0 %v1891_v5 }
  0x4c   : > { %1786 = vmatpush3.bf16.msra.mxu1 %v1891_v5 }
  0x4d   : > { %1012 = vmatmul.mubr.bf16.gmra.mxu0 %v1864_v62  ;;  %1751 = vmatprep.subr.bf16.mxu1 %v1898_v8 }
  0x4e   : > { %1109 = vmatmul.mubr.bf16.gmra.mxu1 %v1865_v63  ;;  %1019 = vmatprep.mubr.bf16.mxu0 %v1868_v2 }
  0x4f   : > { %1116 = vmatprep.mubr.bf16.mxu1 %v1870_v3 }
  0x55   : > { %1020 = vmatmul.mubr.bf16.gmra.mxu0 %v1872_v6 }
  0x56   : > { %1117 = vmatmul.mubr.bf16.gmra.mxu1 %v1873_v7  ;;  %1027 = vmatprep.mubr.bf16.mxu0 %v1876_v9 }
  0x57   : > { %1124 = vmatprep.mubr.bf16.mxu1 %v1878_v10 }
  0x5d   : > { %1028 = vmatmul.mubr.bf16.gmra.mxu0 %v1880_v11 }
  0x5e   : > { %1125 = vmatmul.mubr.bf16.gmra.mxu1 %v1881_v12  ;;  %1035 = vmatprep.mubr.bf16.mxu0 %v1884_v13 }
  0x5f   : > { %1132 = vmatprep.mubr.bf16.mxu1 %v1886_v14 }
  0x65   : > { %1036 = vmatmul.mubr.bf16.gmra.mxu0 %v1888_v15 }
  0x66   : > { %1133 = vmatmul.mubr.bf16.gmra.mxu1 %v1889_v16  ;;  %1173 = vmatprep.mubr.bf16.mxu0 %v1894_v17 }
  0x67   : > { %1221 = vmatprep.mubr.bf16.mxu1 %v1897_v18 }
  0x6d   : > { %1174 = vmatmul.mubr.bf16.vlgmr.msra.gmra.mxu0 %v1892_v19 }
  0x6e   : > { %1222 = vmatmul.mubr.bf16.vlgmr.msra.gmra.mxu1 %v1895_v20  ;;  %1181 = vmatprep.mubr.bf16.mxu0 %v1899_v21 }
  0x6f   : > { %1752 = vmatpush3.bf16.msra.mxu1 %v1898_v8  ;;  %1229 = vmatprep.mubr.bf16.mxu1 %v1901_v22 }
  0x70   : > { %1753 = vmatprep.subr.bf16.mxu1 %v1905_v23 }
  0x73   : > { %1754 = vmatpush3.bf16.msra.mxu1 %v1905_v23 }
  0x75   : > { %1182 = vmatmul.mubr.bf16.gmra.mxu0 %v1903_v24 }
  0x76   : > { %1230 = vmatmul.mubr.bf16.gmra.mxu1 %v1904_v25  ;;  %1189 = vmatprep.mubr.bf16.mxu0 %v1906_v26 }
  0x77   : > { %1755 = vmatprep.mubr.msk.bf16.mxu1 %vm922_vm0, %v1908_v27 }
  0x7d   : > { %1190 = vmatmul.mubr.bf16.gmra.mxu0 %v1909_v28 }
  0x7e   : > { %1756 = vmatmul.mubr.msk.bf16.vlgmr.msra.gmra.mxu1 %vm922_vm0, %v1910_v29  ;;  %1197 = vmatprep.mubr.bf16.mxu0 %v1911_v30 }
  0x7f   : > { %1759 = vmatprep.mubr.msk.bf16.mxu1 %vm922_vm0, %v1913_v31 }
  0x85   : > { %1198 = vmatmul.mubr.bf16.gmra.mxu0 %v1914_v32 }
  0x86   : > { %1760 = vmatmul.mubr.msk.bf16.gmra.mxu1 %vm922_vm0, %v1915_v33  ;;  %1205 = vmatprep.mubr.bf16.mxu0 %v1916_v34 }
  0x87   : > { %1763 = vmatprep.mubr.msk.bf16.mxu1 %vm922_vm0, %v1918_v35 }
  0x8d   : > { %1206 = vmatmul.mubr.bf16.gmra.mxu0 %v1919_v36 }
  0x8e   : > { %1764 = vmatmul.mubr.msk.bf16.gmra.mxu1 %vm922_vm0, %v1920_v37  ;;  %1213 = vmatprep.mubr.bf16.mxu0 %v1921_v38 }
  0x8f   : > { %1767 = vmatprep.mubr.msk.bf16.mxu1 %vm922_vm0, %v1923_v39 }
  0x95   : > { %1214 = vmatmul.mubr.bf16.gmra.mxu0 %v1924_v40 }
  0x96   : > { %1768 = vmatmul.mubr.msk.bf16.gmra.mxu1 %vm922_vm0, %v1925_v41 }
  0xed   : > { %v1565_v42 = vpop.f32.mrf.mxu0 }
  0xee   : > { %v1629_v43 = vpop.f32.mrf.mxu1 }
  0xef   : > { %v1566_v44 = vpop.f32.mrf.mxu0 }
  0xf0   : > { %v1567_v45 = vadd.f32 %v1566_v44, %v1565_v42  ;;  %v1630_v46 = vpop.f32.mrf.mxu1 }
  0xf1   : > { %v1631_v47 = vadd.f32 %v1630_v46, %v1629_v43  ;;  %v1568_v48 = vpop.f32.mrf.mxu0 }
  0xf2   : > { %v1632_v49 = vpop.f32.mrf.mxu1 }
  0xf3   : > { %v2183_v50 = vadd.f32 %v1631_v47, %v1567_v45  ;;  %v1569_v51 = vpop.f32.mrf.mxu0 }
  0xf4   : > { %v1570_v52 = vadd.f32 %v1569_v51, %v1568_v48  ;;  %v1633_v53 = vpop.f32.mrf.mxu1 }
  0xf5   : > { %v1634_v54 = vadd.f32 %v1633_v53, %v1632_v49  ;;  %v1571_v55 = vpop.f32.mrf.mxu0 }
  0xf6   : > { %v1635_v56 = vpop.f32.mrf.mxu1 }
  0xf7   : > { %v2185_v57 = vadd.f32 %v1634_v54, %v1570_v52  ;;  %v1572_v58 = vpop.f32.mrf.mxu0 }
  0xf8   : > { %v1573_v59 = vadd.f32 %v1572_v58, %v1571_v55  ;;  %v1636_v60 = vpop.f32.mrf.mxu1 }
  0xf9   : > { %v1637_v61 = vadd.f32 %v1636_v60, %v1635_v56  ;;  %v1574_v62 = vpop.f32.mrf.mxu0 }
  0xfa   : > { %v1638_v63 = vpop.f32.mrf.mxu1 }
  0xfb   : > { %v2187_v0 = vadd.f32 %v1637_v61, %v1573_v59  ;;  %v1575_v1 = vpop.f32.mrf.mxu0 }
  0xfc   : > { %v1576_v2 = vadd.f32 %v1575_v1, %v1574_v62  ;;  %v1639_v3 = vpop.f32.mrf.mxu1 }
  0xfd   : > { %v1640_v4 = vadd.f32 %v1639_v3, %v1638_v63  ;;  %v1577_v5 = vpop.f32.mrf.mxu0 }
  0xfe   : > { %v1641_v6 = vpop.f32.mrf.mxu1 }
  0xff   : > { %v2189_v7 = vadd.f32 %v1640_v4, %v1576_v2  ;;  %v1578_v8 = vpop.f32.mrf.mxu0 }
 0x100   : > { %v1579_v9 = vadd.f32 %v1578_v8, %v1577_v5  ;;  %v1642_v10 = vpop.f32.mrf.mxu1 }
 0x101   : > { %v1643_v11 = vadd.f32 %v1642_v10, %v1641_v6  ;;  %v1580_v12 = vpop.f32.mrf.mxu0 }
 0x102   : > { %v1644_v13 = vpop.f32.mrf.mxu1 }
 0x103   : > { %v2191_v14 = vadd.f32 %v1643_v11, %v1579_v9  ;;  %v1581_v15 = vpop.f32.mrf.mxu0 }
 0x104   : > { %v1582_v16 = vadd.f32 %v1581_v15, %v1580_v12  ;;  %v1645_v17 = vpop.f32.mrf.mxu1 }
 0x105   : > { %v1646_v18 = vadd.f32 %v1645_v17, %v1644_v13  ;;  %v1583_v19 = vpop.f32.mrf.mxu0 }
 0x106   : > { %v1647_v20 = vpop.f32.mrf.mxu1 }
 0x107   : > { %v2193_v21 = vadd.f32 %v1646_v18, %v1582_v16  ;;  %v1584_v22 = vpop.f32.mrf.mxu0 }
 0x108   : > { %v1585_v23 = vadd.f32 %v1584_v22, %v1583_v19  ;;  %v1648_v24 = vpop.f32.mrf.mxu1 }
 0x109   : > { %v1649_v25 = vadd.f32 %v1648_v24, %v1647_v20  ;;  %v1586_v26 = vpop.f32.mrf.mxu0 }
 0x10a   : > { %v1650_v27 = vpop.f32.mrf.mxu1 }
 0x10b   : > { %v2195_v28 = vadd.f32 %v1649_v25, %v1585_v23  ;;  %v1587_v29 = vpop.f32.mrf.mxu0 }
 0x10c   : > { %v1588_v30 = vadd.f32 %v1587_v29, %v1586_v26  ;;  %v1651_v31 = vpop.f32.mrf.mxu1 }
 0x10d   : > { %v1652_v32 = vadd.f32 %v1651_v31, %v1650_v27  ;;  %v1589_v33 = vpop.f32.mrf.mxu0 }
 0x10e   : > { %v1653_v34 = vpop.f32.mrf.mxu1 }
 0x10f   : > { %v2197_v35 = vadd.f32 %v1652_v32, %v1588_v30  ;;  %v1590_v36 = vpop.f32.mrf.mxu0 }
 0x110   : > { %v1591_v37 = vadd.f32 %v1590_v36, %v1589_v33  ;;  %v1654_v38 = vpop.f32.mrf.mxu1 }
 0x111   : > { %v1655_v39 = vadd.f32 %v1654_v38, %v1653_v34  ;;  %v1592_v40 = vpop.f32.mrf.mxu0 }
 0x112   : > { %v1656_v41 = vpop.f32.mrf.mxu1 }
 0x113   : > { %v2199_v42 = vadd.f32 %v1655_v39, %v1591_v37  ;;  %v1593_v43 = vpop.f32.mrf.mxu0 }
 0x114   : > { %v1594_v44 = vadd.f32 %v1593_v43, %v1592_v40  ;;  %v1657_v45 = vpop.f32.mrf.mxu1 }
 0x115   : > { %v1658_v46 = vadd.f32 %v1657_v45, %v1656_v41  ;;  %v1595_v47 = vpop.f32.mrf.mxu0 }
 0x116   : > { %v1659_v48 = vpop.f32.mrf.mxu1 }
 0x117   : > { %v2201_v49 = vadd.f32 %v1658_v46, %v1594_v44  ;;  %v1596_v51 = vpop.f32.mrf.mxu0 }
 0x118   : > { %v1597_v52 = vadd.f32 %v1596_v51, %v1595_v47  ;;  %v1660_v53 = vpop.f32.mrf.mxu1 }
 0x119   : > { %2356 = vst [vmem:[#allocation2_spill] sm:$0xff] %v2201_v49  ;;  %v1661_v54 = vadd.f32 %v1660_v53, %v1659_v48  ;;  %v2203_v55 = vpop.f32.mrf.mxu0 }
 0x11a   : > { %v2205_v56 = vpop.f32.mrf.mxu1 }
 0x11b   : > { %v2207_v58 = vadd.f32 %v1661_v54, %v1597_v52  ;;  %v2209_v59 = vpop.f32.mrf.mxu0 }
 0x11c   : > { %v2211_v60 = vpop.f32.mrf.mxu1 }
 0x11d   : > { %2357 = vst [vmem:[#allocation3_spill] sm:$0xff] %v2207_v58  ;;  %v2213_v61 = vpop.f32.mrf.mxu0 }
 0x11e   : > { %v2215_v62 = vpop.f32.mrf.mxu1 }
 0x11f   : > { %v2217_v63 = vpop.f32.mrf.mxu0 }
 0x120   : > { %v2219_v1 = vpop.f32.mrf.mxu1 }
 0x121   : > { %v2221_v2 = vpop.f32.mrf.mxu0 }
 0x122   : > { %v2223_v3 = vpop.f32.mrf.mxu1 }
 0x123   : > { %v2225_v4 = vpop.f32.mrf.mxu0 }
 0x124   : > { %v2227_v5 = vpop.f32.mrf.mxu1 }
 0x125   : > { %v2229_v6 = vpop.f32.mrf.mxu0 }
 0x126   : > { %v2231_v8 = vpop.f32.mrf.mxu1 }
 0x127   : > { %v2233_v9 = vpop.f32.mrf.mxu0 }
 0x128   : > { %v2235_v10 = vpop.f32.mrf.mxu1 }
 0x129   : > { %v2237_v11 = vpop.f32.mrf.mxu0 }
 0x12a   : > { %v2239_v12 = vpop.f32.mrf.mxu1 }
 0x12b   : > { %v2241_v13 = vpop.f32.mrf.mxu0 }
 0x12c   : > { %v2243_v15 = vpop.f32.mrf.mxu1 }
 0x12d   : > { %2358 = vst [vmem:[#allocation4_spill] sm:$0xff] %v2243_v15  ;;  %v1693_v16 = vpop.f32.mrf.mxu0 }
 0x12e   : > { %v2245_v17 = vpop.f32.mrf.mxu1 }
 0x12f   : > { %v1694_v18 = vpop.f32.mrf.mxu0 }
 0x130   : > { %v2247_v19 = vpop.f32.mrf.mxu1  ;;  %v1695_v41 = vadd.f32 %v1694_v18, %v1693_v16 }
 0x131   : > { %v1696_v20 = vpop.f32.mrf.mxu0 }
 0x132   : > { %v2249_v22 = vpop.f32.mrf.mxu1  ;;  %v1176_v52 = vadd.f32 %v1695_v41, %v2183_v50  ;;  %v1603_v41 = vadd.f32 %v2217_v63, %v2213_v61 }
 0x133   : > { %v1697_v23 = vpop.f32.mrf.mxu0 }
 0x134   : > { %v2251_v24 = vpop.f32.mrf.mxu1  ;;  %v1698_v51 = vadd.f32 %v1697_v23, %v1696_v20 }
 0x135   : > { %v1699_v25 = vpop.f32.mrf.mxu0 }
 0x136   : > { %v2253_v26 = vpop.f32.mrf.mxu1  ;;  %v1179_v20 = vadd.f32 %v1698_v51, %v2185_v57  ;;  %v1731_v51 = vadd.f32 %v2247_v19, %v2245_v17 }
 0x137   : > { %v1700_v27 = vpop.f32.mrf.mxu0 }
 0x138   : > { %v2255_v29 = vpop.f32.mrf.mxu1  ;;  %v1701_v47 = vadd.f32 %v1700_v27, %v1699_v25 }
 0x139   : > { %v1702_v30 = vpop.f32.mrf.mxu0  ;;  %v1737_v17 = vadd.f32 %v2255_v29, %v2253_v26 }
 0x13a   : > { %v2257_v31 = vpop.f32.mrf.mxu1 }
 0x13b   : > { %2359 = vst [vmem:[#allocation5_spill] sm:$0xff] %v2257_v31  ;;  %v1703_v32 = vpop.f32.mrf.mxu0 }
 0x13c   : > { %v2259_v33 = vpop.f32.mrf.mxu1  ;;  %v1704_v18 = vadd.f32 %v1703_v32, %v1702_v30 }
 0x13d   : > { %2360 = vst [vmem:[#allocation6_spill] sm:$0xff] %v2259_v33  ;;  %v1705_v34 = vpop.f32.mrf.mxu0 }
 0x13e   : > { %v1757_v36 = vpop.f32.mrf.mxu1  ;;  %v1187_v57 = vadd.f32 %v1704_v18, %v2189_v7 }
 0x13f   : > { %v1706_v37 = vpop.f32.mrf.mxu0 }
 0x140   : > { %v1272_v38 = vpop.f32.mrf.mxu1  ;;  %v1707_v43 = vadd.f32 %v1706_v37, %v1705_v34  ;;  %v1184_v34 = vadd.f32 %v1701_v47, %v2187_v0 }
 0x141   : > { %v1708_v39 = vpop.f32.mrf.mxu0  ;;  %v2263_v49 = vadd.f32 %v1272_v38, %v1176_v52  ;;  %v1606_v52 = vadd.f32 %v2225_v4, %v2221_v2  ;;  %v1734_v2 = vadd.f32 %v2251_v24, %v2249_v22 }
 0x142   : > { %v1758_v40 = vpop.f32.mrf.mxu1  ;;  %v1192_v58 = vadd.f32 %v1707_v43, %v2191_v14  ;;  %v2273_v37 = vadd.f32 %v1757_v36, %v1184_v34  ;;  %v1667_v43 = vadd.f32 %v2219_v1, %v2215_v62  ;;  %v1609_v62 = vadd.f32 %v2233_v9, %v2229_v6  ;;  %v2361_v9 = vld [vmem:[#allocation4_spill] sm:$0xff]  ;;  %v2363_v22 = vld [vmem:[#allocation5_spill] sm:$0xff] }
 0x143   : > { %v1709_v44 = vpop.f32.mrf.mxu0  ;;  %v1673_v1 = vadd.f32 %v2235_v10, %v2231_v8  ;;  %v1600_v6 = vadd.f32 %v2209_v59, %v2203_v55  ;;  %v1664_v8 = vadd.f32 %v2211_v60, %v2205_v56  ;;  %v1676_v10 = vadd.f32 %v2361_v9, %v2239_v12  ;;  %v2362_v55 = vld [vmem:[#allocation2_spill] sm:$0xff] }
 0x144   : > { %v1275_v45 = vpop.f32.mrf.mxu1  ;;  %v1710_v53 = vadd.f32 %v1709_v44, %v1708_v39  ;;  %v2291_v44 = vadd.f32 %v1758_v40, %v1187_v57  ;;  %v1127_v63 = vadd.f32 %v1667_v43, %v1603_v41  ;;  %v2364_v24 = vld [vmem:[#allocation6_spill] sm:$0xff] }
 0x145   : > { %v1711_v46 = vpop.f32.mrf.mxu0  ;;  %v2277_v30 = vadd.f32 %v1275_v45, %v1179_v20 }
 0x146   : > { %v1761_v48 = vpop.f32.mrf.mxu1  ;;  %v1195_v14 = vadd.f32 %v1710_v53, %v2193_v21  ;;  %v1670_v53 = vadd.f32 %v2227_v5, %v2223_v3  ;;  %v1224_v3 = vadd.f32 %v1731_v51, %v1127_v63  ;;  %v1135_v5 = vadd.f32 %v1673_v1, %v1609_v62 }
 0x147   : > { %v1712_v54 = vpop.f32.mrf.mxu0 }
 0x148   : > { %v1713_v33 = vadd.f32 %v1712_v54, %v1711_v46  ;;  %v1288_v31 = vpop.f32.mrf.mxu1  ;;  %v1130_v34 = vadd.f32 %v1670_v53, %v1606_v52  ;;  %v1232_v20 = vadd.f32 %v1737_v17, %v1135_v5 }
 0x149   : > { %v2265_v15 = vadd.f32 %v1288_v31, %v1192_v58  ;;  %v1714_v16 = vpop.f32.mrf.mxu0 }
 0x14a   : > { %v1200_v25 = vadd.f32 %v1713_v33, %v2195_v28  ;;  %v1762_v27 = vpop.f32.mrf.mxu1 }
 0x14b   : > { %v1336_v50 = vmax.f32 %v2263_v49, %v2265_v15  ;;  %v1715_v23 = vpop.f32.mrf.mxu0 }
 0x14c   : > { %v2275_v38 = vadd.f32 %v1761_v48, %v1200_v25  ;;  %v1716_v58 = vadd.f32 %v1715_v23, %v1714_v16  ;;  %v1291_v31 = vpop.f32.mrf.mxu1  ;;  %v2365_v23 = vld [vmem:[#allocation3_spill] sm:$0xff] }
 0x14d   : > { %v2279_v0 = vadd.f32 %v1291_v31, %v1195_v14  ;;  %v1717_v28 = vpop.f32.mrf.mxu0  ;;  %v1227_v31 = vadd.f32 %v1734_v2, %v1130_v34 }
 0x14e   : > { %v1338_v32 = vmax.f32 %v2273_v37, %v2275_v38  ;;  %v1203_v33 = vadd.f32 %v1716_v58, %v2197_v35  ;;  %v1765_v21 = vpop.f32.mrf.mxu1 }
 0x14f   : > { %v1337_v36 = vmax.f32 %v2277_v30, %v2279_v0  ;;  %v1718_v39 = vpop.f32.mrf.mxu0 }
 0x150   : > { %v2293_v45 = vadd.f32 %v1762_v27, %v1203_v33  ;;  %v1304_v7 = vpop.f32.mrf.mxu1  ;;  %v1719_v46 = vadd.f32 %v1718_v39, %v1717_v28  ;;  %v1740_v27 = vadd.f32 %v2364_v24, %v2363_v22  ;;  %v1546_v39 = vld [vmem:[%s2354_s2] ss:$0 sm:$0xff] }
 0x151   : > { %v1720_v47 = vpop.f32.mrf.mxu0 }
 0x152   : > { %v1339_v35 = vmax.f32 %v2291_v44, %v2293_v45  ;;  %v1766_v48 = vpop.f32.mrf.mxu1  ;;  %v1208_v54 = vadd.f32 %v1719_v46, %v2199_v42  ;;  %v1612_v42 = vadd.f32 %v2241_v13, %v2237_v11  ;;  %v1122_v13 = vadd.f32 %v1664_v8, %v1600_v6 }
 0x153   : > { %v1721_v61 = vpop.f32.mrf.mxu0 }
 0x154   : > { %v1307_v40 = vpop.f32.mrf.mxu1  ;;  %v1722_v16 = vadd.f32 %v1721_v61, %v1720_v47  ;;  %v1305_v25 = vadd.f32 %v1304_v7, %v1208_v54  ;;  %v1138_v28 = vadd.f32 %v1676_v10, %v1612_v42 }
 0x155   : > { %v1723_v18 = vpop.f32.mrf.mxu0 }
 0x156   : > { %v1769_v19 = vpop.f32.mrf.mxu1  ;;  %v1211_v59 = vadd.f32 %v1722_v16, %v2362_v55  ;;  %v1235_v61 = vadd.f32 %v1740_v27, %v1138_v28 }
 0x157   : > { %v1724_v4 = vpop.f32.mrf.mxu0  ;;  %v1329_v57 = vadd.f32 %v1769_v19, %v1232_v20 }
 0x158   : > { %v1725_v26 = vadd.f32 %v1724_v4, %v1723_v18  ;;  %v1320_v29 = vpop.f32.mrf.mxu1  ;;  %v1308_v7 = vadd.f32 %v1307_v40, %v1211_v59 }
 0x159   : > { %v1321_v56 = vadd.f32 %v1320_v29, %v1224_v3  ;;  %v1726_v60 = vpop.f32.mrf.mxu0 }
 0x15a   : > { %v1216_v14 = vadd.f32 %v1725_v26, %v2365_v23  ;;  %v1770_v11 = vpop.f32.mrf.mxu1 }
 0x15b   : > { %v1340_v58 = vmax.f32 %v1305_v25, %v1321_v56  ;;  %v1727_v12 = vpop.f32.mrf.mxu0  ;;  %v1332_v40 = vadd.f32 %v1770_v11, %v1235_v61 }
 0x15c   : > { %v1313_v33 = vadd.f32 %v1765_v21, %v1216_v14  ;;  %v1728_v41 = vadd.f32 %v1727_v12, %v1726_v60  ;;  %v1323_v43 = vpop.f32.mrf.mxu1 }
 0x15d   : > { %v1344_v46 = vmax.f32 %v1336_v50, %v1340_v58  ;;  %v1324_v47 = vadd.f32 %v1323_v43, %v1227_v31 }
 0x15e   : > { %v1342_v51 = vmax.f32 %v1313_v33, %v1329_v57  ;;  %v1219_v63 = vadd.f32 %v1728_v41, %v1122_v13 }
 0x15f   : > { %v1354_v62 = vadd.f32 %v1546_v39, %v1344_v46  ;;  %v1341_v1 = vmax.f32 %v1308_v7, %v1324_v47 }
 0x160   : > { %v1346_v21 = vmax.f32 %v1338_v32, %v1342_v51  ;;  %v1316_v52 = vadd.f32 %v1766_v48, %v1219_v63 }
 0x161   : > { %v1358_v53 = vmax.f32 %v1354_v62, 0.0  ;;  %v1345_v49 = vmax.f32 %v1337_v36, %v1341_v1 }
 0x162   : > { %v1356_v15 = vadd.f32 %v1546_v39, %v1346_v21  ;;  %v1343_v50 = vmax.f32 %v1316_v52, %v1332_v40 }
 0x163   : > { %1363 = vst.msk [vmem:[%s175_s25] sm:$0xff] %vm1362_vm1, %v1358_v53  ;;  %v1355_v54 = vadd.f32 %v1546_v39, %v1345_v49 }
 0x164   : > { %v1360_v16 = vmax.f32 %v1356_v15, 0.0  ;;  %v1347_v37 = vmax.f32 %v1339_v35, %v1343_v50 }
 0x165   : > { %v1359_v38 = vmax.f32 %v1355_v54, 0.0 }
 0x166   : > { %v1357_v32 = vadd.f32 %v1546_v39, %v1347_v37  ;;  %1365 = vst.msk [vmem:[%s175_s25 + $0x10] sm:$0xff] %vm1362_vm1, %v1360_v16 }
 0x167   : > { %1364 = vst.msk [vmem:[%s175_s25 + $0x8] sm:$0xff] %vm1362_vm1, %v1359_v38 }
 0x168   : > { %v1361_v48 = vmax.f32 %v1357_v32, 0.0 }
 0x16a   : > { %1366 = vst.msk [vmem:[%s175_s25 + $0x18] sm:$0xff] %vm1362_vm1, %v1361_v48 }
 0x16b PF: > { %s13_s12 = sadd.s32 1, %s1932_s12  }
 0x16c   : > { %p10_p5 = scmp.ge.s32.totalorder %s13_s12, 4  }
 0x16e   :  { %12 = sbr.rel (!%p10_p5) target bundleno = 1 (0x1), region = 62 }

// kernel: cnn_forward.5
= control target key start
LH: loop header
LB: loop body
LE: loop exit
PB: predicated region body
PF: predicated region fallthrough
CT: control target
= control target key end

     0   :  { %vm1259_vm0 = vcmask 523264   ;;  %s2979_s1 = inlined_call_operand.vmem [shape: bf16[1600,256], index: 1, kind: input, shape index: {}]   ;;  %s2980_s0 = inlined_call_operand.vmem [shape: f32[8,1600], index: 0, kind: input, shape index: {}]   ;;  %s2981_s3 = inlined_call_operand.vmem [shape: f32[256,128], index: 3, kind: input, shape index: {}]   ;;  %s2982_s2 = inlined_call_operand.vmem [shape: f32[1,256], index: 2, kind: input, shape index: {}]   ;;  %s2983_s4 = inlined_call_operand.vmem [shape: f32[1,128], index: 4, kind: input, shape index: {}]   ;;  %s2984_s5 = inlined_call_operand.vmem [shape: f32[8,128], index: 5, kind: output, shape index: {}]  }
   0x1   :  { %v1904_v0 = vld [vmem:[%s2979_s1 + $0x74] ss:$8 sps:$4 sm:$0xff]   ;;  %v1906_v1 = vld [vmem:[%s2979_s1 + $0x70] ss:$8 sps:$4 sm:$0xff]   ;;  %v1910_v4 = vld [vmem:[%s2979_s1 + $0x64] ss:$8 sps:$4 sm:$0xff]  }
   0x2   :  { %1263 = vmatprep.subr.bf16.mxu0 %v1904_v0  ;;  %v1907_v2 = vld [vmem:[%s2979_s1 + $0x174] ss:$8 sps:$4 sm:$0xff]   ;;  %v1909_v3 = vld [vmem:[%s2979_s1 + $0x170] ss:$8 sps:$4 sm:$0xff]   ;;  %v1912_v5 = vld [vmem:[%s2979_s1 + $0x60] ss:$8 sps:$4 sm:$0xff]  }
   0x3   :  { %1264 = vmatpush1.bf16.msra.mxu0 %v1906_v1  ;;  %1304 = vmatprep.subr.bf16.mxu1 %v1907_v2  ;;  %v1913_v6 = vld [vmem:[%s2979_s1 + $0x164] ss:$8 sps:$4 sm:$0xff]   ;;  %v1915_v7 = vld [vmem:[%s2979_s1 + $0x160] ss:$8 sps:$4 sm:$0xff]   ;;  %v1916_v8 = vld [vmem:[%s2979_s1 + $0x54] ss:$8 sps:$4 sm:$0xff]  }
   0x4   :  { %1305 = vmatpush1.bf16.msra.mxu1 %v1909_v3  ;;  %1265 = vmatprep.subr.bf16.mxu0 %v1910_v4  ;;  %v1918_v9 = vld [vmem:[%s2979_s1 + $0x50] ss:$8 sps:$4 sm:$0xff]   ;;  %v1919_v10 = vld [vmem:[%s2979_s1 + $0x154] ss:$8 sps:$4 sm:$0xff]   ;;  %v1922_v11 = vld [vmem:[%s2979_s1 + $0x44] ss:$8 sps:$4 sm:$0xff]  }
   0x5   :  { %1306 = vmatprep.subr.bf16.mxu1 %v1913_v6  ;;  %v1921_v12 = vld [vmem:[%s2979_s1 + $0x150] ss:$8 sps:$4 sm:$0xff]   ;;  %v1925_v13 = vld [vmem:[%s2979_s1 + $0x144] ss:$8 sps:$4 sm:$0xff]   ;;  %v1924_v14 = vld [vmem:[%s2979_s1 + $0x40] ss:$8 sps:$4 sm:$0xff]  }
   0x6   :  { %v1928_v15 = vld [vmem:[%s2979_s1 + $0x34] ss:$8 sps:$4 sm:$0xff]   ;;  %v1927_v16 = vld [vmem:[%s2979_s1 + $0x140] ss:$8 sps:$4 sm:$0xff]   ;;  %v1930_v18 = vld [vmem:[%s2979_s1 + $0x30] ss:$8 sps:$4 sm:$0xff]  }
   0x7   :  { %1266 = vmatpush1.bf16.msra.mxu0 %v1912_v5  ;;  %v1931_v17 = vld [vmem:[%s2979_s1 + $0x134] ss:$8 sps:$4 sm:$0xff]   ;;  %v1934_v19 = vld [vmem:[%s2979_s1 + $0x24] ss:$8 sps:$4 sm:$0xff]   ;;  %v1933_v20 = vld [vmem:[%s2979_s1 + $0x130] ss:$8 sps:$4 sm:$0xff]  }
   0x8   :  { %1267 = vmatprep.subr.bf16.mxu0 %v1916_v8  ;;  %1307 = vmatpush1.bf16.msra.mxu1 %v1915_v7  ;;  %v1937_v21 = vld [vmem:[%s2979_s1 + $0x124] ss:$8 sps:$4 sm:$0xff]   ;;  %v1936_v22 = vld [vmem:[%s2979_s1 + $0x20] ss:$8 sps:$4 sm:$0xff]   ;;  %v1940_v23 = vld [vmem:[%s2979_s1 + $0x14] ss:$8 sps:$4 sm:$0xff]  }
   0x9   :  { %1308 = vmatprep.subr.bf16.mxu1 %v1919_v10  ;;  %v1939_v24 = vld [vmem:[%s2979_s1 + $0x120] ss:$8 sps:$4 sm:$0xff]   ;;  %v1943_v25 = vld [vmem:[%s2979_s1 + $0x114] ss:$8 sps:$4 sm:$0xff]   ;;  %v1942_v26 = vld [vmem:[%s2979_s1 + $0x10] ss:$8 sps:$4 sm:$0xff]  }
   0xa   :  { %v1946_v27 = vld [vmem:[%s2979_s1 + $0x4] ss:$8 sps:$4 sm:$0xff]   ;;  %v1945_v28 = vld [vmem:[%s2979_s1 + $0x110] ss:$8 sps:$4 sm:$0xff]   ;;  %v1948_v30 = vld [vmem:[%s2979_s1] ss:$8 sps:$4 sm:$0xff]  }
   0xb   :  { %1268 = vmatpush1.bf16.msra.mxu0 %v1918_v9  ;;  %v1949_v29 = vld [vmem:[%s2979_s1 + $0x104] ss:$8 sps:$4 sm:$0xff]   ;;  %v1952_v31 = vld [vmem:[%s2979_s1 + $0xf4] ss:$8 sps:$4 sm:$0xff]   ;;  %v1951_v32 = vld [vmem:[%s2979_s1 + $0x100] ss:$8 sps:$4 sm:$0xff]  }
   0xc   :  { %1269 = vmatprep.subr.bf16.mxu0 %v1922_v11  ;;  %1309 = vmatpush1.bf16.msra.mxu1 %v1921_v12  ;;  %v1955_v33 = vld [vmem:[%s2979_s1 + $0x1f4] ss:$8 sps:$4 sm:$0xff]   ;;  %v1954_v34 = vld [vmem:[%s2979_s1 + $0xf0] ss:$8 sps:$4 sm:$0xff]   ;;  %v1958_v35 = vld [vmem:[%s2979_s1 + $0xe4] ss:$8 sps:$4 sm:$0xff]  }
   0xd   :  { %1310 = vmatprep.subr.bf16.mxu1 %v1925_v13  ;;  %v1957_v36 = vld [vmem:[%s2979_s1 + $0x1f0] ss:$8 sps:$4 sm:$0xff]   ;;  %v1961_v37 = vld [vmem:[%s2979_s1 + $0x1e4] ss:$8 sps:$4 sm:$0xff]   ;;  %v1960_v38 = vld [vmem:[%s2979_s1 + $0xe0] ss:$8 sps:$4 sm:$0xff]  }
   0xe   :  { %v1964_v39 = vld [vmem:[%s2979_s1 + $0xd4] ss:$8 sps:$4 sm:$0xff]   ;;  %v1963_v40 = vld [vmem:[%s2979_s1 + $0x1e0] ss:$8 sps:$4 sm:$0xff]   ;;  %v1966_v42 = vld [vmem:[%s2979_s1 + $0xd0] ss:$8 sps:$4 sm:$0xff]  }
   0xf   :  { %1270 = vmatpush1.bf16.msra.mxu0 %v1924_v14  ;;  %v1967_v41 = vld [vmem:[%s2979_s1 + $0x1d4] ss:$8 sps:$4 sm:$0xff]   ;;  %v1970_v43 = vld [vmem:[%s2979_s1 + $0xc4] ss:$8 sps:$4 sm:$0xff]   ;;  %v1969_v44 = vld [vmem:[%s2979_s1 + $0x1d0] ss:$8 sps:$4 sm:$0xff]  }
  0x10   :  { %1271 = vmatprep.subr.bf16.mxu0 %v1928_v15  ;;  %1311 = vmatpush1.bf16.msra.mxu1 %v1927_v16  ;;  %v1973_v45 = vld [vmem:[%s2979_s1 + $0x1c4] ss:$8 sps:$4 sm:$0xff]   ;;  %v1972_v47 = vld [vmem:[%s2979_s1 + $0xc0] ss:$8 sps:$4 sm:$0xff]   ;;  %v1976_v49 = vld [vmem:[%s2979_s1 + $0xb4] ss:$8 sps:$4 sm:$0xff]  }
  0x11   :  { %1312 = vmatprep.subr.bf16.mxu1 %v1931_v17  ;;  %v222_v46 = vld [vmem:[%s2980_s0 + $0x8] sm:$0xff]  ;;  %v224_v50 = vld [vmem:[%s2980_s0 + $0x18] sm:$0xff]  ;;  %v221_v4 = vld [vmem:[%s2980_s0] sm:$0xff] }
  0x12   :  { %v235_v48 = vpack.c.bf16 %v222_v46, %v222_v46  ;;  %v1975_v51 = vld [vmem:[%s2979_s1 + $0x1c0] ss:$8 sps:$4 sm:$0xff]   ;;  %v237_v52 = vpack.c.bf16 %v224_v50, %v224_v50  ;;  %v1979_v53 = vld [vmem:[%s2979_s1 + $0x1b4] ss:$8 sps:$4 sm:$0xff]   ;;  %v1978_v54 = vld [vmem:[%s2979_s1 + $0xb0] ss:$8 sps:$4 sm:$0xff]   ;;  %v234_v7 = vpack.c.bf16 %v221_v4, %v221_v4 }
  0x13   :  { %1272 = vmatpush1.bf16.msra.mxu0 %v1930_v18  ;;  %v1982_v55 = vld [vmem:[%s2979_s1 + $0xa4] ss:$8 sps:$4 sm:$0xff]   ;;  %v1981_v56 = vld [vmem:[%s2979_s1 + $0x1b0] ss:$8 sps:$4 sm:$0xff]   ;;  %v1984_v58 = vld [vmem:[%s2979_s1 + $0xa0] ss:$8 sps:$4 sm:$0xff]  }
  0x14   :  { %1273 = vmatprep.subr.bf16.mxu0 %v1934_v19  ;;  %1313 = vmatpush1.bf16.msra.mxu1 %v1933_v20  ;;  %v1985_v57 = vld [vmem:[%s2979_s1 + $0x1a4] ss:$8 sps:$4 sm:$0xff]   ;;  %v1988_v59 = vld [vmem:[%s2979_s1 + $0x94] ss:$8 sps:$4 sm:$0xff]   ;;  %v1987_v60 = vld [vmem:[%s2979_s1 + $0x1a0] ss:$8 sps:$4 sm:$0xff]  }
  0x15   :  { %1314 = vmatprep.subr.bf16.mxu1 %v1937_v21  ;;  %1295 = vmatprep.mubr.bf16.mxu0 %v235_v48  ;;  %v1991_v61 = vld [vmem:[%s2979_s1 + $0x194] ss:$8 sps:$4 sm:$0xff]   ;;  %v1990_v62 = vld [vmem:[%s2979_s1 + $0x90] ss:$8 sps:$4 sm:$0xff]   ;;  %v1994_v63 = vld [vmem:[%s2979_s1 + $0x84] ss:$8 sps:$4 sm:$0xff]  }
  0x16   :  { %1336 = vmatprep.mubr.bf16.mxu1 %v237_v52  ;;  %v1993_v0 = vld [vmem:[%s2979_s1 + $0x190] ss:$8 sps:$4 sm:$0xff]   ;;  %v1996_v1 = vld [vmem:[%s2979_s1 + $0x80] ss:$8 sps:$4 sm:$0xff]   ;;  %v1997_v2 = vld [vmem:[%s2979_s1 + $0x184] ss:$8 sps:$4 sm:$0xff]  }
  0x17   :  { %1274 = vmatpush1.bf16.msra.mxu0 %v1936_v22  ;;  %v1999_v3 = vld [vmem:[%s2979_s1 + $0x180] ss:$8 sps:$4 sm:$0xff]   ;;  %v2002_v5 = vld [vmem:[%s2979_s1 + $0x274] ss:$8 sps:$4 sm:$0xff]   ;;  %v2000_v9 = vld [vmem:[%s2979_s1 + $0x270] ss:$8 sps:$4 sm:$0xff]  }
  0x18   :  { %1275 = vmatprep.subr.bf16.mxu0 %v1940_v23  ;;  %1315 = vmatpush1.bf16.msra.mxu1 %v1939_v24  ;;  %v223_v6 = vld [vmem:[%s2980_s0 + $0x10] sm:$0xff]  ;;  %v2008_v11 = vld [vmem:[%s2979_s1 + $0x264] ss:$8 sps:$4 sm:$0xff]   ;;  %v2006_v14 = vld [vmem:[%s2979_s1 + $0x260] ss:$8 sps:$4 sm:$0xff]  }
  0x19   :  { %1316 = vmatprep.subr.bf16.mxu1 %v1943_v25  ;;  %v2005_v8 = vld [vmem:[%s2979_s1 + $0x374] ss:$8 sps:$4 sm:$0xff]   ;;  %v236_v10 = vpack.c.bf16 %v223_v6, %v223_v6  ;;  %v2003_v12 = vld [vmem:[%s2979_s1 + $0x370] ss:$8 sps:$4 sm:$0xff]   ;;  %v2011_v13 = vld [vmem:[%s2979_s1 + $0x364] ss:$8 sps:$4 sm:$0xff]  }
  0x1a   :  { %v2014_v15 = vld [vmem:[%s2979_s1 + $0x254] ss:$8 sps:$4 sm:$0xff]   ;;  %v2009_v16 = vld [vmem:[%s2979_s1 + $0x360] ss:$8 sps:$4 sm:$0xff]   ;;  %v2012_v18 = vld [vmem:[%s2979_s1 + $0x250] ss:$8 sps:$4 sm:$0xff]  }
  0x1b   :  { %1276 = vmatpush1.bf16.msra.mxu0 %v1942_v26  ;;  %v2017_v17 = vld [vmem:[%s2979_s1 + $0x354] ss:$8 sps:$4 sm:$0xff]   ;;  %v2020_v19 = vld [vmem:[%s2979_s1 + $0x244] ss:$8 sps:$4 sm:$0xff]   ;;  %v2015_v20 = vld [vmem:[%s2979_s1 + $0x350] ss:$8 sps:$4 sm:$0xff]  }
  0x1c   :  { %1277 = vmatprep.subr.bf16.mxu0 %v1946_v27  ;;  %1317 = vmatpush1.bf16.msra.mxu1 %v1945_v28  ;;  %v2023_v21 = vld [vmem:[%s2979_s1 + $0x344] ss:$8 sps:$4 sm:$0xff]   ;;  %v2018_v22 = vld [vmem:[%s2979_s1 + $0x240] ss:$8 sps:$4 sm:$0xff]   ;;  %v2026_v23 = vld [vmem:[%s2979_s1 + $0x234] ss:$8 sps:$4 sm:$0xff]  }
  0x1d   :  { %1318 = vmatprep.subr.bf16.mxu1 %v1949_v29  ;;  %v2021_v24 = vld [vmem:[%s2979_s1 + $0x340] ss:$8 sps:$4 sm:$0xff]   ;;  %v2029_v25 = vld [vmem:[%s2979_s1 + $0x334] ss:$8 sps:$4 sm:$0xff]   ;;  %v2024_v26 = vld [vmem:[%s2979_s1 + $0x230] ss:$8 sps:$4 sm:$0xff]  }
  0x1e   :  { %v2032_v27 = vld [vmem:[%s2979_s1 + $0x224] ss:$8 sps:$4 sm:$0xff]   ;;  %v2027_v28 = vld [vmem:[%s2979_s1 + $0x330] ss:$8 sps:$4 sm:$0xff]   ;;  %v2054_v50 = vld [vmem:[%s2979_s1 + $0x2e0] ss:$8 sps:$4 sm:$0xff]  }
  0x1f   :  { %1278 = vmatpush1.bf16.msra.mxu0 %v1948_v30  ;;  %v2035_v29 = vld [vmem:[%s2979_s1 + $0x324] ss:$8 sps:$4 sm:$0xff]   ;;  %v2030_v30 = vld [vmem:[%s2979_s1 + $0x220] ss:$8 sps:$4 sm:$0xff]   ;;  %v2048_v46 = vld [vmem:[%s2979_s1 + $0x2f0] ss:$8 sps:$4 sm:$0xff]  }
  0x20   :  { %1279 = vmatprep.subr.bf16.mxu0 %v1952_v31  ;;  %1319 = vmatpush1.bf16.msra.mxu1 %v1951_v32  ;;  %v2038_v31 = vld [vmem:[%s2979_s1 + $0x214] ss:$8 sps:$4 sm:$0xff]   ;;  %v2033_v32 = vld [vmem:[%s2979_s1 + $0x320] ss:$8 sps:$4 sm:$0xff]   ;;  %v2051_v48 = vld [vmem:[%s2979_s1 + $0x3f0] ss:$8 sps:$4 sm:$0xff]  }
  0x21   :  { %1320 = vmatprep.subr.bf16.mxu1 %v1955_v33  ;;  %v2041_v33 = vld [vmem:[%s2979_s1 + $0x314] ss:$8 sps:$4 sm:$0xff]   ;;  %v2057_v52 = vld [vmem:[%s2979_s1 + $0x3e0] ss:$8 sps:$4 sm:$0xff]   ;;  %v2084_v6 = vld [vmem:[%s2979_s1 + $0x290] ss:$8 sps:$4 sm:$0xff]  }
  0x22   :  { %v2081_v4 = vld [vmem:[%s2979_s1 + $0x3a0] ss:$8 sps:$4 sm:$0xff]  }
  0x23   :  { %1280 = vmatpush2.bf16.msra.mxu0 %v1954_v34  ;;  %v226_v34 = vld [vmem:[%s2980_s0 + $0x28] sm:$0xff] }
  0x24   :  { %1281 = vmatprep.subr.bf16.mxu0 %v1958_v35  ;;  %1321 = vmatpush2.bf16.msra.mxu1 %v1957_v36  ;;  %v2036_v35 = vld [vmem:[%s2979_s1 + $0x210] ss:$8 sps:$4 sm:$0xff]   ;;  %v239_v36 = vpack.c.bf16 %v226_v34, %v226_v34  ;;  %v2114_v34 = vld [vmem:[%s2979_s1 + $0x440] ss:$8 sps:$4 sm:$0xff]  }
  0x25   :  { %1322 = vmatprep.subr.bf16.mxu1 %v1961_v37  ;;  %v2044_v37 = vld [vmem:[%s2979_s1 + $0x204] ss:$8 sps:$4 sm:$0xff]  }
  0x27   :  { %1282 = vmatpush2.bf16.msra.mxu0 %v1960_v38  ;;  %v228_v38 = vld [vmem:[%s2980_s0 + $0x38] sm:$0xff] }
  0x28   :  { %1283 = vmatprep.subr.bf16.mxu0 %v1964_v39  ;;  %1323 = vmatpush2.bf16.msra.mxu1 %v1963_v40  ;;  %v2039_v39 = vld [vmem:[%s2979_s1 + $0x310] ss:$8 sps:$4 sm:$0xff]   ;;  %v241_v40 = vpack.c.bf16 %v228_v38, %v228_v38 }
  0x29   :  { %1324 = vmatprep.subr.bf16.mxu1 %v1967_v41  ;;  %v2047_v41 = vld [vmem:[%s2979_s1 + $0x304] ss:$8 sps:$4 sm:$0xff]   ;;  %v2120_v38 = vld [vmem:[%s2979_s1 + $0x430] ss:$8 sps:$4 sm:$0xff]  }
  0x2b   :  { %1284 = vmatpush2.bf16.msra.mxu0 %v1966_v42  ;;  %v2042_v42 = vld [vmem:[%s2979_s1 + $0x200] ss:$8 sps:$4 sm:$0xff]  }
  0x2c   :  { %1285 = vmatprep.subr.bf16.mxu0 %v1970_v43  ;;  %1325 = vmatpush2.bf16.msra.mxu1 %v1969_v44  ;;  %v2050_v43 = vld [vmem:[%s2979_s1 + $0x2f4] ss:$8 sps:$4 sm:$0xff]   ;;  %v2045_v44 = vld [vmem:[%s2979_s1 + $0x300] ss:$8 sps:$4 sm:$0xff]  }
  0x2d   :  { %1326 = vmatprep.subr.bf16.mxu1 %v1973_v45  ;;  %v2053_v45 = vld [vmem:[%s2979_s1 + $0x3f4] ss:$8 sps:$4 sm:$0xff]  }
  0x2f   :  { %1286 = vmatpush2.bf16.msra.mxu0 %v1972_v47  ;;  %v2056_v47 = vld [vmem:[%s2979_s1 + $0x2e4] ss:$8 sps:$4 sm:$0xff]  }
  0x30   :  { %1287 = vmatprep.subr.bf16.mxu0 %v1976_v49  ;;  %1327 = vmatpush2.bf16.msra.mxu1 %v1975_v51  ;;  %v2059_v49 = vld [vmem:[%s2979_s1 + $0x3e4] ss:$8 sps:$4 sm:$0xff]   ;;  %v2062_v51 = vld [vmem:[%s2979_s1 + $0x2d4] ss:$8 sps:$4 sm:$0xff]  }
  0x31   :  { %1328 = vmatprep.subr.bf16.mxu1 %v1979_v53  ;;  %v2065_v53 = vld [vmem:[%s2979_s1 + $0x3d4] ss:$8 sps:$4 sm:$0xff]  }
  0x33   :  { %1288 = vmatpush2.bf16.msra.mxu0 %v1978_v54  ;;  %v2060_v54 = vld [vmem:[%s2979_s1 + $0x2d0] ss:$8 sps:$4 sm:$0xff]  }
  0x34   :  { %1289 = vmatprep.subr.bf16.mxu0 %v1982_v55  ;;  %1329 = vmatpush2.bf16.msra.mxu1 %v1981_v56  ;;  %v2068_v55 = vld [vmem:[%s2979_s1 + $0x2c4] ss:$8 sps:$4 sm:$0xff]   ;;  %v2063_v56 = vld [vmem:[%s2979_s1 + $0x3d0] ss:$8 sps:$4 sm:$0xff]  }
  0x35   :  { %1330 = vmatprep.subr.bf16.mxu1 %v1985_v57  ;;  %v2071_v57 = vld [vmem:[%s2979_s1 + $0x3c4] ss:$8 sps:$4 sm:$0xff]  }
  0x37   :  { %1290 = vmatpush2.bf16.msra.mxu0 %v1984_v58  ;;  %v2066_v58 = vld [vmem:[%s2979_s1 + $0x2c0] ss:$8 sps:$4 sm:$0xff]  }
  0x38   :  { %1291 = vmatprep.subr.bf16.mxu0 %v1988_v59  ;;  %1331 = vmatpush2.bf16.msra.mxu1 %v1987_v60  ;;  %v2074_v59 = vld [vmem:[%s2979_s1 + $0x2b4] ss:$8 sps:$4 sm:$0xff]   ;;  %v2069_v60 = vld [vmem:[%s2979_s1 + $0x3c0] ss:$8 sps:$4 sm:$0xff]  }
  0x39   :  { %1332 = vmatprep.subr.bf16.mxu1 %v1991_v61  ;;  %v2077_v61 = vld [vmem:[%s2979_s1 + $0x3b4] ss:$8 sps:$4 sm:$0xff]  }
  0x3b   :  { %1292 = vmatpush2.bf16.msra.mxu0 %v1990_v62  ;;  %v2072_v62 = vld [vmem:[%s2979_s1 + $0x2b0] ss:$8 sps:$4 sm:$0xff]  }
  0x3c   :  { %1293 = vmatprep.subr.bf16.mxu0 %v1994_v63  ;;  %1333 = vmatpush2.bf16.msra.mxu1 %v1993_v0  ;;  %v2080_v63 = vld [vmem:[%s2979_s1 + $0x2a4] ss:$8 sps:$4 sm:$0xff]   ;;  %v2075_v0 = vld [vmem:[%s2979_s1 + $0x3b0] ss:$8 sps:$4 sm:$0xff]  }
  0x3d   :  { %1334 = vmatprep.subr.bf16.mxu1 %v1997_v2  ;;  %v2078_v2 = vld [vmem:[%s2979_s1 + $0x2a0] ss:$8 sps:$4 sm:$0xff]  }
  0x3f   :  { %1294 = vmatpush2.bf16.msra.mxu0 %v1996_v1  ;;  %v2083_v1 = vld [vmem:[%s2979_s1 + $0x3a4] ss:$8 sps:$4 sm:$0xff]  }
  0x40   :  { %1345 = vmatprep.subr.bf16.mxu0 %v2002_v5  ;;  %1335 = vmatpush2.bf16.msra.mxu1 %v1999_v3  ;;  %v2086_v3 = vld [vmem:[%s2979_s1 + $0x294] ss:$8 sps:$4 sm:$0xff]  }
  0x41   :  { %1386 = vmatprep.subr.bf16.mxu1 %v2005_v8  ;;  %v2089_v5 = vld [vmem:[%s2979_s1 + $0x394] ss:$8 sps:$4 sm:$0xff]   ;;  %v2087_v8 = vld [vmem:[%s2979_s1 + $0x390] ss:$8 sps:$4 sm:$0xff]  }
  0x42   :  { %1296 = vmatmul.mubr.bf16.vlgmr.msra.gmra.mxu0 %v234_v7  ;;  %v2092_v7 = vld [vmem:[%s2979_s1 + $0x284] ss:$8 sps:$4 sm:$0xff]  }
  0x43   :  { %1346 = vmatpush1.bf16.msra.mxu0 %v2000_v9  ;;  %1337 = vmatmul.mubr.bf16.vlgmr.msra.gmra.mxu1 %v236_v10  ;;  %v2090_v9 = vld [vmem:[%s2979_s1 + $0x280] ss:$8 sps:$4 sm:$0xff]   ;;  %v2095_v10 = vld [vmem:[%s2979_s1 + $0x384] ss:$8 sps:$4 sm:$0xff]  }
  0x44   :  { %1347 = vmatprep.subr.bf16.mxu0 %v2008_v11  ;;  %1387 = vmatpush1.bf16.msra.mxu1 %v2003_v12  ;;  %v2093_v11 = vld [vmem:[%s2979_s1 + $0x380] ss:$8 sps:$4 sm:$0xff]  }
  0x45   :  { %1388 = vmatprep.subr.bf16.mxu1 %v2011_v13  ;;  %1377 = vmatprep.mubr.bf16.mxu0 %v239_v36  ;;  %v225_v12 = vld [vmem:[%s2980_s0 + $0x20] sm:$0xff]  ;;  %v2098_v13 = vld [vmem:[%s2979_s1 + $0x474] ss:$8 sps:$4 sm:$0xff]  }
  0x46   :  { %1418 = vmatprep.mubr.bf16.mxu1 %v241_v40  ;;  %v2117_v36 = vld [vmem:[%s2979_s1 + $0x540] ss:$8 sps:$4 sm:$0xff]   ;;  %v2123_v40 = vld [vmem:[%s2979_s1 + $0x530] ss:$8 sps:$4 sm:$0xff]  }
  0x47   :  { %1348 = vmatpush1.bf16.msra.mxu0 %v2006_v14  ;;  %v227_v14 = vld [vmem:[%s2980_s0 + $0x30] sm:$0xff] }
  0x48   :  { %1349 = vmatprep.subr.bf16.mxu0 %v2014_v15  ;;  %1389 = vmatpush1.bf16.msra.mxu1 %v2009_v16  ;;  %v238_v15 = vpack.c.bf16 %v225_v12, %v225_v12  ;;  %v2101_v16 = vld [vmem:[%s2979_s1 + $0x574] ss:$8 sps:$4 sm:$0xff]   ;;  %v2177_v12 = vld [vmem:[%s2979_s1 + $0x5a0] ss:$8 sps:$4 sm:$0xff]  }
  0x49   :  { %1390 = vmatprep.subr.bf16.mxu1 %v2017_v17  ;;  %v2096_v17 = vld [vmem:[%s2979_s1 + $0x470] ss:$8 sps:$4 sm:$0xff]  }
  0x4b   :  { %1350 = vmatpush1.bf16.msra.mxu0 %v2012_v18  ;;  %v240_v18 = vpack.c.bf16 %v227_v14, %v227_v14  ;;  %v2180_v14 = vld [vmem:[%s2979_s1 + $0x490] ss:$8 sps:$4 sm:$0xff]  }
  0x4c   :  { %1351 = vmatprep.subr.bf16.mxu0 %v2020_v19  ;;  %1391 = vmatpush1.bf16.msra.mxu1 %v2015_v20  ;;  %v2104_v19 = vld [vmem:[%s2979_s1 + $0x464] ss:$8 sps:$4 sm:$0xff]   ;;  %v2099_v20 = vld [vmem:[%s2979_s1 + $0x570] ss:$8 sps:$4 sm:$0xff]  }
  0x4d   :  { %1392 = vmatprep.subr.bf16.mxu1 %v2023_v21  ;;  %v2107_v21 = vld [vmem:[%s2979_s1 + $0x564] ss:$8 sps:$4 sm:$0xff]  }
  0x4f   :  { %1352 = vmatpush1.bf16.msra.mxu0 %v2018_v22  ;;  %v230_v22 = vld [vmem:[%s2980_s0 + $0x48] sm:$0xff] }
  0x50   :  { %1353 = vmatprep.subr.bf16.mxu0 %v2026_v23  ;;  %1393 = vmatpush1.bf16.msra.mxu1 %v2021_v24  ;;  %v2102_v23 = vld [vmem:[%s2979_s1 + $0x460] ss:$8 sps:$4 sm:$0xff]   ;;  %v243_v24 = vpack.c.bf16 %v230_v22, %v230_v22  ;;  %v231_v22 = vld [vmem:[%s2980_s0 + $0x50] sm:$0xff] }
  0x51   :  { %1394 = vmatprep.subr.bf16.mxu1 %v2029_v25  ;;  %v2110_v25 = vld [vmem:[%s2979_s1 + $0x454] ss:$8 sps:$4 sm:$0xff]  }
  0x53   :  { %1354 = vmatpush1.bf16.msra.mxu0 %v2024_v26  ;;  %v232_v26 = vld [vmem:[%s2980_s0 + $0x58] sm:$0xff] }
  0x54   :  { %1355 = vmatprep.subr.bf16.mxu0 %v2032_v27  ;;  %1395 = vmatpush1.bf16.msra.mxu1 %v2027_v28  ;;  %v2105_v27 = vld [vmem:[%s2979_s1 + $0x560] ss:$8 sps:$4 sm:$0xff]   ;;  %v245_v28 = vpack.c.bf16 %v232_v26, %v232_v26  ;;  %v2197_v26 = vld [vmem:[%s2979_s1 + $0x624] ss:$8 sps:$4 sm:$0xff]  }
  0x55   :  { %1396 = vmatprep.subr.bf16.mxu1 %v2035_v29  ;;  %v2113_v29 = vld [vmem:[%s2979_s1 + $0x554] ss:$8 sps:$4 sm:$0xff]  }
  0x57   :  { %1356 = vmatpush1.bf16.msra.mxu0 %v2030_v30  ;;  %v2108_v30 = vld [vmem:[%s2979_s1 + $0x450] ss:$8 sps:$4 sm:$0xff]  }
  0x58   :  { %1357 = vmatprep.subr.bf16.mxu0 %v2038_v31  ;;  %1397 = vmatpush1.bf16.msra.mxu1 %v2033_v32  ;;  %v2116_v31 = vld [vmem:[%s2979_s1 + $0x444] ss:$8 sps:$4 sm:$0xff]   ;;  %v2111_v32 = vld [vmem:[%s2979_s1 + $0x550] ss:$8 sps:$4 sm:$0xff]  }
  0x59   :  { %1398 = vmatprep.subr.bf16.mxu1 %v2041_v33  ;;  %v2119_v33 = vld [vmem:[%s2979_s1 + $0x544] ss:$8 sps:$4 sm:$0xff]  }
  0x5b   :  { %1358 = vmatpush1.bf16.msra.mxu0 %v2036_v35  ;;  %v2122_v35 = vld [vmem:[%s2979_s1 + $0x434] ss:$8 sps:$4 sm:$0xff]  }
  0x5c   :  { %1359 = vmatprep.subr.bf16.mxu0 %v2044_v37  ;;  %1399 = vmatpush1.bf16.msra.mxu1 %v2039_v39  ;;  %v2125_v37 = vld [vmem:[%s2979_s1 + $0x534] ss:$8 sps:$4 sm:$0xff]   ;;  %v2128_v39 = vld [vmem:[%s2979_s1 + $0x424] ss:$8 sps:$4 sm:$0xff]  }
  0x5d   :  { %1400 = vmatprep.subr.bf16.mxu1 %v2047_v41  ;;  %v2131_v41 = vld [vmem:[%s2979_s1 + $0x524] ss:$8 sps:$4 sm:$0xff]  }
  0x5f   :  { %1360 = vmatpush1.bf16.msra.mxu0 %v2042_v42  ;;  %v2126_v42 = vld [vmem:[%s2979_s1 + $0x420] ss:$8 sps:$4 sm:$0xff]  }
  0x60   :  { %1361 = vmatprep.subr.bf16.mxu0 %v2050_v43  ;;  %1401 = vmatpush1.bf16.msra.mxu1 %v2045_v44  ;;  %v2134_v43 = vld [vmem:[%s2979_s1 + $0x414] ss:$8 sps:$4 sm:$0xff]   ;;  %v2129_v44 = vld [vmem:[%s2979_s1 + $0x520] ss:$8 sps:$4 sm:$0xff]  }
  0x61   :  { %1402 = vmatprep.subr.bf16.mxu1 %v2053_v45  ;;  %v2137_v45 = vld [vmem:[%s2979_s1 + $0x514] ss:$8 sps:$4 sm:$0xff]  }
  0x63   :  { %1362 = vmatpush2.bf16.msra.mxu0 %v2048_v46  ;;  %v2132_v46 = vld [vmem:[%s2979_s1 + $0x410] ss:$8 sps:$4 sm:$0xff]  }
  0x64   :  { %1363 = vmatprep.subr.bf16.mxu0 %v2056_v47  ;;  %1403 = vmatpush2.bf16.msra.mxu1 %v2051_v48  ;;  %v2140_v47 = vld [vmem:[%s2979_s1 + $0x404] ss:$8 sps:$4 sm:$0xff]   ;;  %v2135_v48 = vld [vmem:[%s2979_s1 + $0x510] ss:$8 sps:$4 sm:$0xff]  }
  0x65   :  { %1404 = vmatprep.subr.bf16.mxu1 %v2059_v49  ;;  %v2143_v49 = vld [vmem:[%s2979_s1 + $0x504] ss:$8 sps:$4 sm:$0xff]  }
  0x67   :  { %1364 = vmatpush2.bf16.msra.mxu0 %v2054_v50  ;;  %v2138_v50 = vld [vmem:[%s2979_s1 + $0x400] ss:$8 sps:$4 sm:$0xff]  }
  0x68   :  { %1365 = vmatprep.subr.bf16.mxu0 %v2062_v51  ;;  %1405 = vmatpush2.bf16.msra.mxu1 %v2057_v52  ;;  %v2146_v51 = vld [vmem:[%s2979_s1 + $0x4f4] ss:$8 sps:$4 sm:$0xff]   ;;  %v2141_v52 = vld [vmem:[%s2979_s1 + $0x500] ss:$8 sps:$4 sm:$0xff]  }
  0x69   :  { %1406 = vmatprep.subr.bf16.mxu1 %v2065_v53  ;;  %v2149_v53 = vld [vmem:[%s2979_s1 + $0x5f4] ss:$8 sps:$4 sm:$0xff]  }
  0x6b   :  { %1366 = vmatpush2.bf16.msra.mxu0 %v2060_v54  ;;  %v2144_v54 = vld [vmem:[%s2979_s1 + $0x4f0] ss:$8 sps:$4 sm:$0xff]  }
  0x6c   :  { %1367 = vmatprep.subr.bf16.mxu0 %v2068_v55  ;;  %1407 = vmatpush2.bf16.msra.mxu1 %v2063_v56  ;;  %v2152_v55 = vld [vmem:[%s2979_s1 + $0x4e4] ss:$8 sps:$4 sm:$0xff]   ;;  %v2147_v56 = vld [vmem:[%s2979_s1 + $0x5f0] ss:$8 sps:$4 sm:$0xff]  }
  0x6d   :  { %1408 = vmatprep.subr.bf16.mxu1 %v2071_v57  ;;  %v2155_v57 = vld [vmem:[%s2979_s1 + $0x5e4] ss:$8 sps:$4 sm:$0xff]  }
  0x6f   :  { %1368 = vmatpush2.bf16.msra.mxu0 %v2066_v58  ;;  %v2150_v58 = vld [vmem:[%s2979_s1 + $0x4e0] ss:$8 sps:$4 sm:$0xff]  }
  0x70   :  { %1369 = vmatprep.subr.bf16.mxu0 %v2074_v59  ;;  %1409 = vmatpush2.bf16.msra.mxu1 %v2069_v60  ;;  %v2158_v59 = vld [vmem:[%s2979_s1 + $0x4d4] ss:$8 sps:$4 sm:$0xff]   ;;  %v2153_v60 = vld [vmem:[%s2979_s1 + $0x5e0] ss:$8 sps:$4 sm:$0xff]  }
  0x71   :  { %1410 = vmatprep.subr.bf16.mxu1 %v2077_v61  ;;  %v2161_v61 = vld [vmem:[%s2979_s1 + $0x5d4] ss:$8 sps:$4 sm:$0xff]  }
  0x73   :  { %1370 = vmatpush2.bf16.msra.mxu0 %v2072_v62  ;;  %v2156_v62 = vld [vmem:[%s2979_s1 + $0x4d0] ss:$8 sps:$4 sm:$0xff]  }
  0x74   :  { %1371 = vmatprep.subr.bf16.mxu0 %v2080_v63  ;;  %1411 = vmatpush2.bf16.msra.mxu1 %v2075_v0  ;;  %v2164_v63 = vld [vmem:[%s2979_s1 + $0x4c4] ss:$8 sps:$4 sm:$0xff]   ;;  %v2159_v0 = vld [vmem:[%s2979_s1 + $0x5d0] ss:$8 sps:$4 sm:$0xff]  }
  0x75   :  { %1412 = vmatprep.subr.bf16.mxu1 %v2083_v1  ;;  %v2167_v1 = vld [vmem:[%s2979_s1 + $0x5c4] ss:$8 sps:$4 sm:$0xff]  }
  0x77   :  { %1372 = vmatpush2.bf16.msra.mxu0 %v2078_v2  ;;  %v2162_v2 = vld [vmem:[%s2979_s1 + $0x4c0] ss:$8 sps:$4 sm:$0xff]  }
  0x78   :  { %1373 = vmatprep.subr.bf16.mxu0 %v2086_v3  ;;  %1413 = vmatpush2.bf16.msra.mxu1 %v2081_v4  ;;  %v2170_v3 = vld [vmem:[%s2979_s1 + $0x4b4] ss:$8 sps:$4 sm:$0xff]   ;;  %v2165_v4 = vld [vmem:[%s2979_s1 + $0x5c0] ss:$8 sps:$4 sm:$0xff]  }
  0x79   :  { %1414 = vmatprep.subr.bf16.mxu1 %v2089_v5  ;;  %v2173_v5 = vld [vmem:[%s2979_s1 + $0x5b4] ss:$8 sps:$4 sm:$0xff]  }
  0x7b   :  { %1374 = vmatpush2.bf16.msra.mxu0 %v2084_v6  ;;  %v2168_v6 = vld [vmem:[%s2979_s1 + $0x4b0] ss:$8 sps:$4 sm:$0xff]  }
  0x7c   :  { %1375 = vmatprep.subr.bf16.mxu0 %v2092_v7  ;;  %1415 = vmatpush2.bf16.msra.mxu1 %v2087_v8  ;;  %v2176_v7 = vld [vmem:[%s2979_s1 + $0x4a4] ss:$8 sps:$4 sm:$0xff]   ;;  %v2171_v8 = vld [vmem:[%s2979_s1 + $0x5b0] ss:$8 sps:$4 sm:$0xff]  }
  0x7d   :  { %1416 = vmatprep.subr.bf16.mxu1 %v2095_v10  ;;  %v2174_v10 = vld [vmem:[%s2979_s1 + $0x4a0] ss:$8 sps:$4 sm:$0xff]  }
  0x7f   :  { %1376 = vmatpush2.bf16.msra.mxu0 %v2090_v9  ;;  %v2179_v9 = vld [vmem:[%s2979_s1 + $0x5a4] ss:$8 sps:$4 sm:$0xff]  }
  0x80   :  { %1427 = vmatprep.subr.bf16.mxu0 %v2098_v13  ;;  %1417 = vmatpush2.bf16.msra.mxu1 %v2093_v11  ;;  %v2182_v11 = vld [vmem:[%s2979_s1 + $0x494] ss:$8 sps:$4 sm:$0xff]  }
  0x81   :  { %1468 = vmatprep.subr.bf16.mxu1 %v2101_v16  ;;  %v2185_v13 = vld [vmem:[%s2979_s1 + $0x594] ss:$8 sps:$4 sm:$0xff]   ;;  %v2183_v16 = vld [vmem:[%s2979_s1 + $0x590] ss:$8 sps:$4 sm:$0xff]  }
  0x82   :  { %1378 = vmatmul.mubr.bf16.vlgmr.msra.gmra.mxu0 %v238_v15  ;;  %v2188_v15 = vld [vmem:[%s2979_s1 + $0x484] ss:$8 sps:$4 sm:$0xff]  }
  0x83   :  { %1428 = vmatpush1.bf16.msra.mxu0 %v2096_v17  ;;  %1419 = vmatmul.mubr.bf16.vlgmr.msra.gmra.mxu1 %v240_v18  ;;  %v2191_v17 = vld [vmem:[%s2979_s1 + $0x584] ss:$8 sps:$4 sm:$0xff]   ;;  %v2186_v18 = vld [vmem:[%s2979_s1 + $0x480] ss:$8 sps:$4 sm:$0xff]  }
  0x84   :  { %1429 = vmatprep.subr.bf16.mxu0 %v2104_v19  ;;  %1469 = vmatpush1.bf16.msra.mxu1 %v2099_v20  ;;  %v229_v19 = vld [vmem:[%s2980_s0 + $0x40] sm:$0xff]  ;;  %v2194_v20 = vld [vmem:[%s2979_s1 + $0x634] ss:$8 sps:$4 sm:$0xff]  }
  0x85   :  { %1459 = vmatprep.mubr.bf16.mxu0 %v243_v24  ;;  %1470 = vmatprep.subr.bf16.mxu1 %v2107_v21  ;;  %v2189_v21 = vld [vmem:[%s2979_s1 + $0x580] ss:$8 sps:$4 sm:$0xff]   ;;  %v2192_v24 = vld [vmem:[%s2979_s1 + $0x630] ss:$8 sps:$4 sm:$0xff]  }
  0x86   :  { %1500 = vmatprep.mubr.bf16.mxu1 %v245_v28  ;;  %v2204_v28 = vmov 0  }
  0x87   :  { %1430 = vmatpush1.bf16.msra.mxu0 %v2102_v23  ;;  %v242_v23 = vpack.c.bf16 %v229_v19, %v229_v19  ;;  %v1553_v19 = vld [vmem:[%s2981_s3 + $0x8] sm:$0xff] }
  0x88   :  { %1431 = vmatprep.subr.bf16.mxu0 %v2110_v25  ;;  %1471 = vmatpush1.bf16.msra.mxu1 %v2105_v27  ;;  %v244_v25 = vpack.c.bf16 %v231_v22, %v231_v22  ;;  %v2195_v27 = vld [vmem:[%s2979_s1 + $0x620] ss:$8 sps:$4 sm:$0xff]  }
  0x89   :  { %1472 = vmatprep.subr.bf16.mxu1 %v2113_v29  ;;  %v2200_v29 = vld [vmem:[%s2979_s1 + $0x614] ss:$8 sps:$4 sm:$0xff]  }
  0x8b   :  { %1432 = vmatpush1.bf16.msra.mxu0 %v2108_v30  ;;  %v2198_v30 = vld [vmem:[%s2979_s1 + $0x610] ss:$8 sps:$4 sm:$0xff]  }
  0x8c   :  { %1433 = vmatprep.subr.bf16.mxu0 %v2116_v31  ;;  %1473 = vmatpush1.bf16.msra.mxu1 %v2111_v32  ;;  %v2203_v31 = vld [vmem:[%s2979_s1 + $0x604] ss:$8 sps:$4 sm:$0xff]   ;;  %v2201_v32 = vld [vmem:[%s2979_s1 + $0x600] ss:$8 sps:$4 sm:$0xff]  }
  0x8d   :  { %1474 = vmatprep.subr.bf16.mxu1 %v2119_v33  ;;  %v233_v33 = vld [vmem:[%s2980_s0 + $0x60] sm:$0xff] }
  0x8f   :  { %1434 = vmatpush1.bf16.msra.mxu0 %v2114_v34  ;;  %v1583_v34 = vld [vmem:[%s2981_s3 + $0xf8] sm:$0xff] }
  0x90   :  { %1435 = vmatprep.subr.bf16.mxu0 %v2122_v35  ;;  %1475 = vmatpush1.bf16.msra.mxu1 %v2117_v36  ;;  %v1567_v35 = vld [vmem:[%s2981_s3 + $0x78] sm:$0xff]  ;;  %v1582_v36 = vld [vmem:[%s2981_s3 + $0xf0] sm:$0xff] }
  0x91   :  { %1476 = vmatprep.subr.bf16.mxu1 %v2125_v37  ;;  %v1566_v37 = vld [vmem:[%s2981_s3 + $0x70] sm:$0xff] }
  0x93   :  { %1436 = vmatpush1.bf16.msra.mxu0 %v2120_v38  ;;  %v1581_v38 = vld [vmem:[%s2981_s3 + $0xe8] sm:$0xff] }
  0x94   :  { %1437 = vmatprep.subr.bf16.mxu0 %v2128_v39  ;;  %1477 = vmatpush1.bf16.msra.mxu1 %v2123_v40  ;;  %v246_v39 = vpack.c.bf16 %v233_v33, %v233_v33  ;;  %v1565_v40 = vld [vmem:[%s2981_s3 + $0x68] sm:$0xff] }
  0x95   :  { %1478 = vmatprep.subr.bf16.mxu1 %v2131_v41  ;;  %v1580_v41 = vld [vmem:[%s2981_s3 + $0xe0] sm:$0xff] }
  0x97   :  { %1438 = vmatpush1.bf16.msra.mxu0 %v2126_v42  ;;  %v1564_v42 = vld [vmem:[%s2981_s3 + $0x60] sm:$0xff] }
  0x98   :  { %1439 = vmatprep.subr.bf16.mxu0 %v2134_v43  ;;  %1479 = vmatpush1.bf16.msra.mxu1 %v2129_v44  ;;  %v249_v43 = vlaneseq }
  0x99   :  { %1480 = vmatprep.subr.bf16.mxu1 %v2137_v45 }
  0x9a   :  { %v250_v44 = vshrl.u32 %v249_v43, 7 }
  0x9b   :  { %1440 = vmatpush1.bf16.msra.mxu0 %v2132_v46  ;;  %v247_v46 = vld [vmem:[%s2982_s2] sm:$0x3] }
  0x9c   :  { %1441 = vmatprep.subr.bf16.mxu0 %v2140_v47  ;;  %1481 = vmatpush1.bf16.msra.mxu1 %v2135_v48  ;;  %v251_v45 = vsub.s32 0, %v250_v44  ;;  %v255_v47 = vsub.s32 1, %v250_v44 }
  0x9d   :  { %1482 = vmatprep.subr.bf16.mxu1 %v2143_v49 }
  0x9e   :  { %v252_v48 = vrot.slane %v247_v46, %v251_v45  ;;  %v256_v49 = vrot.slane %v247_v46, %v255_v47 }
  0x9f   :  { %1442 = vmatpush1.bf16.msra.mxu0 %v2138_v50  ;;  %v1579_v50 = vld [vmem:[%s2981_s3 + $0xd8] sm:$0xff] }
  0xa0   :  { %1443 = vmatprep.subr.bf16.mxu0 %v2146_v51  ;;  %1483 = vmatpush1.bf16.msra.mxu1 %v2141_v52  ;;  %v1563_v52 = vld [vmem:[%s2981_s3 + $0x58] sm:$0xff] }
  0xa1   :  { %1484 = vmatprep.subr.bf16.mxu1 %v2149_v53 }
  0xa3   :  { %1444 = vmatpush2.bf16.msra.mxu0 %v2144_v54  ;;  %v1578_v54 = vld [vmem:[%s2981_s3 + $0xd0] sm:$0xff] }
  0xa4   :  { %1445 = vmatprep.subr.bf16.mxu0 %v2152_v55  ;;  %1485 = vmatpush2.bf16.msra.mxu1 %v2147_v56 }
  0xa5   :  { %1486 = vmatprep.subr.bf16.mxu1 %v2155_v57  ;;  %v1562_v57 = vld [vmem:[%s2981_s3 + $0x50] sm:$0xff] }
  0xa7   :  { %1446 = vmatpush2.bf16.msra.mxu0 %v2150_v58 }
  0xa8   :  { %1447 = vmatprep.subr.bf16.mxu0 %v2158_v59  ;;  %1487 = vmatpush2.bf16.msra.mxu1 %v2153_v60  ;;  %v1577_v60 = vld [vmem:[%s2981_s3 + $0xc8] sm:$0xff] }
  0xa9   :  { %1488 = vmatprep.subr.bf16.mxu1 %v2161_v61 }
  0xab   :  { %1448 = vmatpush2.bf16.msra.mxu0 %v2156_v62 }
  0xac   :  { %1449 = vmatprep.subr.bf16.mxu0 %v2164_v63  ;;  %1489 = vmatpush2.bf16.msra.mxu1 %v2159_v0  ;;  %v1561_v63 = vld [vmem:[%s2981_s3 + $0x48] sm:$0xff] }
  0xad   :  { %1490 = vmatprep.subr.bf16.mxu1 %v2167_v1  ;;  %v1576_v1 = vld [vmem:[%s2981_s3 + $0xc0] sm:$0xff] }
  0xaf   :  { %1450 = vmatpush2.bf16.msra.mxu0 %v2162_v2 }
  0xb0   :  { %1451 = vmatprep.subr.bf16.mxu0 %v2170_v3  ;;  %1491 = vmatpush2.bf16.msra.mxu1 %v2165_v4  ;;  %v1560_v4 = vld [vmem:[%s2981_s3 + $0x40] sm:$0xff] }
  0xb1   :  { %1492 = vmatprep.subr.bf16.mxu1 %v2173_v5  ;;  %v1575_v5 = vld [vmem:[%s2981_s3 + $0xb8] sm:$0xff] }
  0xb3   :  { %1452 = vmatpush2.bf16.msra.mxu0 %v2168_v6  ;;  %v1559_v6 = vld [vmem:[%s2981_s3 + $0x38] sm:$0xff] }
  0xb4   :  { %1453 = vmatprep.subr.bf16.mxu0 %v2176_v7  ;;  %1493 = vmatpush2.bf16.msra.mxu1 %v2171_v8  ;;  %v1574_v7 = vld [vmem:[%s2981_s3 + $0xb0] sm:$0xff] }
  0xb5   :  { %1494 = vmatprep.subr.bf16.mxu1 %v2179_v9  ;;  %v1558_v9 = vld [vmem:[%s2981_s3 + $0x30] sm:$0xff] }
  0xb7   :  { %1454 = vmatpush2.bf16.msra.mxu0 %v2174_v10  ;;  %v1573_v10 = vld [vmem:[%s2981_s3 + $0xa8] sm:$0xff] }
  0xb8   :  { %1455 = vmatprep.subr.bf16.mxu0 %v2182_v11  ;;  %1495 = vmatpush2.bf16.msra.mxu1 %v2177_v12  ;;  %v1557_v11 = vld [vmem:[%s2981_s3 + $0x28] sm:$0xff]  ;;  %v1572_v12 = vld [vmem:[%s2981_s3 + $0xa0] sm:$0xff] }
  0xb9   :  { %1496 = vmatprep.subr.bf16.mxu1 %v2185_v13  ;;  %v1556_v13 = vld [vmem:[%s2981_s3 + $0x20] sm:$0xff] }
  0xbb   :  { %1456 = vmatpush2.bf16.msra.mxu0 %v2180_v14  ;;  %v1571_v14 = vld [vmem:[%s2981_s3 + $0x98] sm:$0xff] }
  0xbc   :  { %1457 = vmatprep.subr.bf16.mxu0 %v2188_v15  ;;  %1497 = vmatpush2.bf16.msra.mxu1 %v2183_v16  ;;  %v1555_v15 = vld [vmem:[%s2981_s3 + $0x18] sm:$0xff]  ;;  %v1570_v16 = vld [vmem:[%s2981_s3 + $0x90] sm:$0xff] }
  0xbd   :  { %1498 = vmatprep.subr.bf16.mxu1 %v2191_v17  ;;  %v1554_v17 = vld [vmem:[%s2981_s3 + $0x10] sm:$0xff] }
  0xbf   :  { %1458 = vmatpush2.bf16.msra.mxu0 %v2186_v18  ;;  %v1569_v18 = vld [vmem:[%s2981_s3 + $0x88] sm:$0xff] }
  0xc0   :  { %1517 = vmatprep.subr.bf16.mxu0 %v2194_v20  ;;  %1499 = vmatpush2.bf16.msra.mxu1 %v2189_v21  ;;  %v1568_v20 = vld [vmem:[%s2981_s3 + $0x80] sm:$0xff] }
  0xc1   :  { %1868 = vmatprep.subr.mxu1 %v1583_v34  ;;  %v1552_v21 = vld [vmem:[%s2981_s3] sm:$0xff] }
  0xc2   :  { %1460 = vmatmul.mubr.bf16.vlgmr.msra.gmra.mxu0 %v242_v23 }
  0xc3   :  { %1518 = vmatpush1.bf16.msra.mxu0 %v2192_v24  ;;  %1541 = vmatprep.mubr.bf16.mxu0 %v2204_v28 }
  0xc4   :  { %1501 = vmatmul.mubr.bf16.vlgmr.msra.gmra.mxu1 %v244_v25  ;;  %1519 = vmatprep.subr.bf16.mxu0 %v2197_v26 }
  0xc5   :  { %1869 = vmatpush3.msra.mxu1 %v1567_v35 }
  0xc6   :  { %1870 = vmatprep.subr.mxu1 %v1582_v36 }
  0xc7   :  { %1520 = vmatpush1.bf16.msra.mxu0 %v2195_v27  ;;  %1871 = vmatpush3.msra.mxu1 %v1566_v37 }
  0xc8   :  { %1521 = vmatprep.subr.bf16.mxu0 %v2200_v29  ;;  %1872 = vmatprep.subr.mxu1 %v1581_v38 }
  0xc9   :  { %1873 = vmatpush3.msra.mxu1 %v1565_v40 }
  0xca   :  { %1874 = vmatprep.subr.mxu1 %v1580_v41 }
  0xcb   :  { %1522 = vmatpush1.bf16.msra.mxu0 %v2198_v30  ;;  %1875 = vmatpush3.msra.mxu1 %v1564_v42 }
  0xcc   :  { %1523 = vmatprep.subr.bf16.mxu0 %v2203_v31  ;;  %1876 = vmatprep.subr.mxu1 %v1579_v50 }
  0xcd   :  { %1877 = vmatpush3.msra.mxu1 %v1563_v52 }
  0xce   :  { %1878 = vmatprep.subr.mxu1 %v1578_v54 }
  0xcf   :  { %1524 = vmatpush1.bf16.msra.mxu0 %v2201_v32  ;;  %1879 = vmatpush3.msra.mxu1 %v1562_v57 }
  0xd0   :  { %1880 = vmatprep.subr.mxu1 %v1577_v60 }
  0xd1   :  { %1881 = vmatpush3.msra.mxu1 %v1561_v63 }
  0xd2   :  { %1866 = vmatmul.mubr.msk.bf16.vlgmr.msra.gmra.mxu0 %vm1259_vm0, %v246_v39  ;;  %1882 = vmatprep.subr.mxu1 %v1576_v1 }
  0xd3   :  { %1883 = vmatpush3.msra.mxu1 %v1560_v4 }
  0xd4   :  { %1884 = vmatprep.subr.mxu1 %v1575_v5 }
  0xd5   :  { %1885 = vmatpush3.msra.mxu1 %v1559_v6 }
  0xd6   :  { %1886 = vmatprep.subr.mxu1 %v1574_v7 }
  0xd7   :  { %1887 = vmatpush3.msra.mxu1 %v1558_v9 }
  0xd8   :  { %1888 = vmatprep.subr.mxu1 %v1573_v10 }
  0xd9   :  { %1889 = vmatpush3.msra.mxu1 %v1557_v11 }
  0xda   :  { %1890 = vmatprep.subr.mxu1 %v1572_v12 }
  0xdb   :  { %1891 = vmatpush3.msra.mxu1 %v1556_v13 }
  0xdc   :  { %1892 = vmatprep.subr.mxu1 %v1571_v14 }
  0xdd   :  { %1893 = vmatpush3.msra.mxu1 %v1555_v15 }
  0xde   :  { %1894 = vmatprep.subr.mxu1 %v1570_v16 }
  0xdf   :  { %1895 = vmatpush3.msra.mxu1 %v1554_v17 }
  0xe0   :  { %1896 = vmatprep.subr.mxu1 %v1569_v18 }
  0xe1   :  { %1897 = vmatpush3.msra.mxu1 %v1553_v19 }
  0xe2   :  { %1898 = vmatprep.subr.mxu1 %v1568_v20 }
  0xe3   :  { %1899 = vmatpush3.msra.mxu1 %v1552_v21 }
 0x102   :  { %v1297_v51 = vpop.f32.mrf.mxu0 }
 0x103   :  { %v1298_v53 = vadd.f32 %v1297_v51, %v252_v48  ;;  %v1338_v56 = vpop.f32.mrf.mxu1 }
 0x104   :  { %v1299_v55 = vpop.f32.mrf.mxu0 }
 0x105   :  { %v1300_v58 = vadd.f32 %v1299_v55, %v256_v49  ;;  %v1339_v59 = vadd.f32 %v1338_v56, %v1298_v53  ;;  %v1340_v62 = vpop.f32.mrf.mxu1  ;;  %v1867_v55 = vld [vmem:[%s2983_s4] ss:$0 sm:$0xff] }
 0x106   :  { %v1301_v61 = vpop.f32.mrf.mxu0 }
 0x107   :  { %v1341_v0 = vadd.f32 %v1340_v62, %v1300_v58  ;;  %v1342_v3 = vpop.f32.mrf.mxu1 }
 0x108   :  { %v1302_v2 = vpop.f32.mrf.mxu0 }
 0x109   :  { %v1343_v8 = vpop.f32.mrf.mxu1 }
 0x142   :  { %v1379_v22 = vpop.f32.mrf.mxu0 }
 0x143   :  { %v1380_v23 = vadd.f32 %v1379_v22, %v1339_v59  ;;  %v1420_v25 = vpop.f32.mrf.mxu1 }
 0x144   :  { %v1381_v24 = vpop.f32.mrf.mxu0 }
 0x145   :  { %v1382_v26 = vadd.f32 %v1381_v24, %v1341_v0  ;;  %v1421_v27 = vadd.f32 %v1420_v25, %v1380_v23  ;;  %v1422_v29 = vpop.f32.mrf.mxu1 }
 0x146   :  { %v1383_v28 = vpop.f32.mrf.mxu0 }
 0x147   :  { %v1423_v30 = vadd.f32 %v1422_v29, %v1382_v26  ;;  %v1424_v32 = vpop.f32.mrf.mxu1 }
 0x148   :  { %v1384_v31 = vpop.f32.mrf.mxu0 }
 0x149   :  { %v1425_v33 = vpop.f32.mrf.mxu1 }
 0x182   :  { %v1461_v34 = vpop.f32.mrf.mxu0 }
 0x183   :  { %v1462_v42 = vadd.f32 %v1461_v34, %v1421_v27 }
 0x184   :  { %v1463_v35 = vpop.f32.mrf.mxu0  ;;  %v1502_v36 = vpop.f32.mrf.mxu1 }
 0x185   :  { %v1464_v43 = vadd.f32 %v1463_v35, %v1423_v30  ;;  %v1503_v44 = vadd.f32 %v1502_v36, %v1462_v42 }
 0x186   :  { %v1465_v37 = vpop.f32.mrf.mxu0  ;;  %v1504_v38 = vpop.f32.mrf.mxu1 }
 0x187   :  { %v1505_v46 = vadd.f32 %v1504_v38, %v1464_v43 }
 0x188   :  { %v1466_v39 = vpop.f32.mrf.mxu0  ;;  %v1506_v40 = vpop.f32.mrf.mxu1 }
 0x18a   :  { %v1507_v41 = vpop.f32.mrf.mxu1 }
 0x192   :  { %v1543_v45 = vpop.f32.mrf.mxu0 }
 0x193   :  { %v1544_v47 = vadd.f32 %v1543_v45, %v1503_v44 }
 0x194   :  { %v1545_v48 = vpop.f32.mrf.mxu0 }
 0x195   :  { %v1546_v49 = vadd.f32 %v1545_v48, %v1505_v46  ;;  %v1550_v52 = vmax.f32 %v1544_v47, 0.0 }
 0x196   :  { %v1547_v50 = vpop.f32.mrf.mxu0 }
 0x197   :  { %v1551_v51 = vmax.f32 %v1546_v49, 0.0 }
 0x198   :  { %v1548_v53 = vpop.f32.mrf.mxu0 }
 0x199   :  { %1655 = vmatprep.mubr.f32.mxu1 %v1551_v51 }
 0x19a   :  { %1656 = vmatmul.mubr.f32.vlgmr.msra.gmra.mxu1 %v1550_v52 }
 0x25a   :  { %v1900_v54 = vpop.f32.mrf.mxu1 }
 0x25c   :  { %v1901_v56 = vpop.f32.mrf.mxu1 }
 0x25d   :  { %v1902_v57 = vadd.f32 %v1901_v56, %v1900_v54 }
 0x25f   :  { %v1658_v58 = vadd.f32 %v1902_v57, %v1867_v55 }
 0x261   :  { %1661 = vst [vmem:[%s2984_s5] sm:$0xff] %v1658_v58 }

</bundles_post_ra>
